<compile_context>
chip_gen: v6e
topology: v6e:2x2x1
jax: 0.10.0
libtpu: 0.0.40
codegen_flags: <defaults>
</compile_context>

<pallas_src>
import functools

import jax
import jax.numpy as jnp
from jax import lax
from jax.experimental import pallas as pl
from jax.experimental.pallas import tpu as pltpu


def _round_up(x, m):
    return (x + m - 1) // m * m


def _pick_b_block(B):
    """Sublane-aligned batch block: <=64 rows (vreg pressure), >=2 blocks when
    possible (v7x megacore), minimal batch padding."""
    B8 = _round_up(B, 8)
    if B8 <= 8:
        return 8
    best_key, best_cand = None, 8
    for cand in range(8, min(64, B8) + 1, 8):
        nblk = -(-B8 // cand)
        pad = nblk * cand - B
        key = (0 if nblk >= 2 else 1, pad, -cand)
        if best_key is None or key < best_key:
            best_key, best_cand = key, cand
    return best_cand


def _pick_t_chunk(T, cap=64):
    """Bound per-chunk VMEM; prefer a chunk size that divides T exactly."""
    if T <= cap:
        return T
    for c in range(cap, 7, -1):
        if T % c == 0:
            return c
    return cap


def _gru_kernel(x_ref, wih_ref, whh_ref, bih_ref, bhhn_ref,
                out_ref, hid_ref, gi_scr, h_scr,
                *, t_valid, needs_mask, unroll):
    """One grid step == (batch block, T chunk).

    Shapes (per block):
      x_ref   (Tc, Bb, E)      time-major embedded inputs (chunk)
      wih_ref (E, 3*Hp)        padded, gate-aligned W_ih^T
      whh_ref (Hp, 3*Hp)       padded, gate-aligned W_hh^T
      bih_ref (1, 3*Hp)        b_ih with b_hh_r / b_hh_z pre-folded in
      bhhn_ref (1, Hp)         n-gate b_hh only
      out_ref (Tc, Bb, Hp)     per-step hidden states (chunk)
      hid_ref (Bb, Hp)         final hidden state (resident across T chunks)
      gi_scr  (Tc, Bb, 3*Hp)   scratch for the hoisted input projection
      h_scr   (Bb, Hp)         hidden-state carry across T chunks
    """
    tc = pl.program_id(1)
    Tc, Bb, E = x_ref.shape
    Hp = hid_ref.shape[-1]
    GH = 3 * Hp

    @pl.when(tc == 0)
    def _():
        h_scr[...] = jnp.zeros_like(h_scr)

    # ---- Phase 1: hoisted input projection for this chunk (one MXU matmul) --
    x_flat = x_ref[...].reshape(Tc * Bb, E)
    gi = jnp.dot(x_flat, wih_ref[...], preferred_element_type=jnp.float32)
    gi = gi + bih_ref[...]                              # (Tc*Bb, 3Hp)
    gi_scr[...] = gi.reshape(Tc, Bb, GH).astype(gi_scr.dtype)

    whh = whh_ref[...]
    bhh_n = bhhn_ref[...]

    # ---- Phase 2: sequential recurrence (only h @ W_hh^T per step) ----------
    def step(t, h):
        gi_t = gi_scr[t].astype(jnp.float32)                       # (Bb, 3Hp)
        gh = jnp.dot(h.astype(whh.dtype), whh,
                     preferred_element_type=jnp.float32)           # (Bb, 3Hp)

        # PyTorch GRU gate order r, z, n at 128-aligned lane offsets.
        s_rz = gi_t[:, 0:2 * Hp] + gh[:, 0:2 * Hp]
        r = jax.nn.sigmoid(s_rz[:, 0:Hp])
        z = jax.nn.sigmoid(s_rz[:, Hp:2 * Hp])
        n = jnp.tanh(gi_t[:, 2 * Hp:GH] + r * (gh[:, 2 * Hp:GH] + bhh_n))
        h_new = n + z * (h - n)

        if needs_mask:  # padded timesteps (only in the last chunk) hold h
            valid = (tc * Tc + t) < t_valid
            h_new = jnp.where(valid, h_new, h)

        out_ref[t] = h_new.astype(out_ref.dtype)        # full-vreg dense store
        return h_new

    h_last = lax.fori_loop(0, Tc, step, h_scr[...], unroll=unroll)
    h_scr[...] = h_last
    hid_ref[...] = h_last.astype(hid_ref.dtype)


def gru_pallas(embedded_tbe, w_ih, w_hh, b_ih, b_hh,
               matmul_dtype=jnp.float32, t_chunk=64):
    """embedded_tbe: (T, B, E).  PyTorch GRU weights:
       w_ih (3H, E), w_hh (3H, H), b_ih (3H,), b_hh (3H,).
       Returns output (T, B, H) time-major and final hidden (B, H).

       matmul_dtype=jnp.bfloat16 is recommended on v6e/v7x (gate math stays
       f32); f32 gives exact agreement with the reference."""
    T, B, E = embedded_tbe.shape
    H = w_hh.shape[1]

    Hp = _round_up(H, 128)                  # lane-aligned hidden size
    GH = 3 * Hp
    B_BLK = _pick_b_block(B)
    Bp = _round_up(B, B_BLK)
    n_bblk = Bp // B_BLK

    T_CHUNK = _pick_t_chunk(T, cap=t_chunk)
    Tp = _round_up(T, T_CHUNK)
    n_tchunk = Tp // T_CHUNK

    f32_mm = jnp.dtype(matmul_dtype) == jnp.dtype(jnp.float32)
    gi_dtype = jnp.float32 if f32_mm else jnp.bfloat16

    # Gate-aligned, transposed, zero-padded weights.  Padded hidden columns
    # provably stay zero (zero W/b => r=z=0.5, n=0 => h'=0.5*h, h0=0).
    wih_p = jnp.zeros((E, GH), matmul_dtype)
    whh_p = jnp.zeros((Hp, GH), matmul_dtype)
    for g in range(3):
        wih_p = wih_p.at[:, g * Hp:g * Hp + H].set(
            w_ih[g * H:(g + 1) * H, :].T.astype(matmul_dtype))
        whh_p = whh_p.at[:H, g * Hp:g * Hp + H].set(
            w_hh[g * H:(g + 1) * H, :].T.astype(matmul_dtype))
    # Fold b_hh_r / b_hh_z into the hoisted input bias; only b_hh_n per step.
    bih_p = jnp.zeros((1, GH), jnp.float32)
    bih_p = bih_p.at[:, 0:H].set((b_ih[0:H] + b_hh[0:H]).astype(jnp.float32))
    bih_p = bih_p.at[:, Hp:Hp + H].set(
        (b_ih[H:2 * H] + b_hh[H:2 * H]).astype(jnp.float32))
    bih_p = bih_p.at[:, 2 * Hp:2 * Hp + H].set(b_ih[2 * H:3 * H].astype(jnp.float32))
    bhhn_p = jnp.zeros((1, Hp), jnp.float32)
    bhhn_p = bhhn_p.at[:, 0:H].set(b_hh[2 * H:3 * H].astype(jnp.float32))

    x = embedded_tbe.astype(matmul_dtype)
    if Bp != B or Tp != T:
        x = jnp.pad(x, ((0, Tp - T), (0, Bp - B), (0, 0)))

    # Explicit VMEM budget: per-block footprint with headroom (cap 64 MiB v7x).
    bmm = jnp.dtype(matmul_dtype).itemsize
    bgi = jnp.dtype(gi_dtype).itemsize
    need = (2 * T_CHUNK * B_BLK * E * bmm          # x, double-buffered
            + 2 * T_CHUNK * B_BLK * Hp * 4         # out, double-buffered
            + T_CHUNK * B_BLK * GH * bgi           # gi scratch
            + 2 * (E + Hp) * GH * bmm              # weights, double-buffered
            + 4 * B_BLK * Hp * 4                   # final hidden + carry
            + 2 * (GH + Hp) * 4)                   # biases
    vmem_limit = int(min(max(2 * need + (1 << 20), 4 << 20), 64 << 20))

    cost = pl.CostEstimate(
        flops=int(2 * Tp * Bp * 3 * Hp * (E + Hp)),
        transcendentals=int(3 * Tp * Bp * Hp),
        bytes_accessed=int(Tp * Bp * E * bmm + Tp * Bp * Hp * 4
                           + (E + Hp) * GH * bmm + Bp * Hp * 4),
    )

    kernel = functools.partial(
        _gru_kernel,
        t_valid=T,
        needs_mask=(Tp != T),
        unroll=(True if T_CHUNK <= 16 else 4),
    )

    out_p, hid_p = pl.pallas_call(
        kernel,
        out_shape=(jax.ShapeDtypeStruct((Tp, Bp, Hp), jnp.float32),
                   jax.ShapeDtypeStruct((Bp, Hp), jnp.float32)),
        grid_spec=pltpu.PrefetchScalarGridSpec(
            num_scalar_prefetch=0,
            grid=(n_bblk, n_tchunk),          # batch blocks x time chunks
            in_specs=[
                pl.BlockSpec((T_CHUNK, B_BLK, E), lambda b, t: (t, b, 0)),  # x
                pl.BlockSpec((E, GH), lambda b, t: (0, 0)),       # W_ih^T
                pl.BlockSpec((Hp, GH), lambda b, t: (0, 0)),      # W_hh^T
                pl.BlockSpec((1, GH), lambda b, t: (0, 0)),       # fused b_ih
                pl.BlockSpec((1, Hp), lambda b, t: (0, 0)),       # b_hh (n gate)
            ],
            out_specs=[
                pl.BlockSpec((T_CHUNK, B_BLK, Hp), lambda b, t: (t, b, 0)),
                pl.BlockSpec((B_BLK, Hp), lambda b, t: (b, 0)),   # final hidden
            ],
            scratch_shapes=[
                pltpu.VMEM((T_CHUNK, B_BLK, GH), gi_dtype),   # hoisted gi
                pltpu.VMEM((B_BLK, Hp), jnp.float32),         # h carry over T
            ],
        ),
        compiler_params=pltpu.CompilerParams(
            dimension_semantics=("parallel", "arbitrary"),
            vmem_limit_bytes=vmem_limit),
        cost_estimate=cost,
    )(x, wih_p, whh_p, bih_p, bhhn_p)

    return out_p[:T, :B, :H], hid_p[:B, :H]


def encoder_forward(input_var, embedding, w_ih, w_hh, b_ih, b_hh,
                    matmul_dtype=jnp.float32):
    """Mirrors Encoder.forward (variable_lengths=False, dropout p=0).
       input_var: (B, T) int32 token ids.
       Returns output (B, T, H), hidden (1, B, H)."""
    # Embedding gather writes time-major directly (only the tiny int id
    # matrix is transposed, not the activations).  Dropout p=0 == identity.
    embedded_tbe = jnp.take(embedding, input_var.T, axis=0)    # (T, B, E)
    out_tbh, h_last = gru_pallas(embedded_tbe, w_ih, w_hh, b_ih, b_hh,
                                 matmul_dtype=matmul_dtype)
    output = jnp.transpose(out_tbh, (1, 0, 2))                 # (B, T, H)
    hidden = h_last[None]                                      # (1, B, H)
    return output, hidden


def _gru_reference(embedded, w_ih, w_hh, b_ih, b_hh):
    """Pure-JAX reference (batch_first), PyTorch GRU semantics."""
    B, T, E = embedded.shape
    H = w_hh.shape[1]

    def step(h, x_t):
        gi = x_t @ w_ih.T + b_ih
        gh = h @ w_hh.T + b_hh
        i_r, i_z, i_n = jnp.split(gi, 3, axis=-1)
        h_r, h_z, h_n = jnp.split(gh, 3, axis=-1)
        r = jax.nn.sigmoid(i_r + h_r)
        z = jax.nn.sigmoid(i_z + h_z)
        n = jnp.tanh(i_n + r * h_n)
        h_new = (1.0 - z) * n + z * h
        return h_new, h_new

    h0 = jnp.zeros((B, H), jnp.float32)
    h_last, outs = lax.scan(step, h0, jnp.transpose(embedded, (1, 0, 2)))
    return jnp.transpose(outs, (1, 0, 2)), h_last[None]


if __name__ == "__main__":
    # Small shapes consistent with Encoder(vocab_size, embed_size, hidden_size)
    vocab_size, embed_size, hidden_size = 50, 32, 32
    batch, seq_len = 2, 8

    key = jax.random.PRNGKey(0)
    k_emb, k_wih, k_whh, k_bih, k_bhh, k_tok = jax.random.split(key, 6)

    scale = 1.0 / jnp.sqrt(hidden_size)
    embedding = jax.random.normal(k_emb, (vocab_size, embed_size), jnp.float32)
    w_ih = jax.random.uniform(k_wih, (3 * hidden_size, embed_size), jnp.float32,
                              -scale, scale)
    w_hh = jax.random.uniform(k_whh, (3 * hidden_size, hidden_size), jnp.float32,
                              -scale, scale)
    b_ih = jax.random.uniform(k_bih, (3 * hidden_size,), jnp.float32, -scale, scale)
    b_hh = jax.random.uniform(k_bhh, (3 * hidden_size,), jnp.float32, -scale, scale)

    input_var = jax.random.randint(k_tok, (batch, seq_len), 0, vocab_size, jnp.int32)

    # f32 path: exact agreement with the reference.
    output, hidden = encoder_forward(input_var, embedding, w_ih, w_hh, b_ih, b_hh)
    output = jax.block_until_ready(output)
    hidden = jax.block_until_ready(hidden)

    emb_ref = jnp.take(embedding, input_var, axis=0)
    out_ref, hid_ref = _gru_reference(emb_ref, w_ih, w_hh, b_ih, b_hh)
    assert output.shape == (batch, seq_len, hidden_size)
    assert hidden.shape == (1, batch, hidden_size)
    assert jnp.allclose(output, out_ref, atol=1e-5, rtol=1e-5)
    assert jnp.allclose(hidden, hid_ref, atol=1e-5, rtol=1e-5)

    # bf16 MXU-operand path (recommended on v6e/v7x); looser tolerance.
    out_bf, hid_bf = encoder_forward(input_var, embedding, w_ih, w_hh, b_ih, b_hh,
                                     matmul_dtype=jnp.bfloat16)
    out_bf = jax.block_until_ready(out_bf)
    hid_bf = jax.block_until_ready(hid_bf)
    assert jnp.allclose(out_bf, out_ref, atol=1e-1, rtol=1e-1)
    assert jnp.allclose(hid_bf, hid_ref, atol=1e-1, rtol=1e-1)

    print("KERNEL_OK")
</pallas_src>

<mosaic_0001>
module attributes {stable_mosaic.version = 11 : i64} {
  func.func @_gru_kernel(%arg0: i32, %arg1: i32, %arg2: memref<8x8x32xf32, #tpu.memory_space<vmem>>, %arg3: memref<32x384xf32, #tpu.memory_space<vmem>>, %arg4: memref<128x384xf32, #tpu.memory_space<vmem>>, %arg5: memref<1x384xf32, #tpu.memory_space<vmem>>, %arg6: memref<1x128xf32, #tpu.memory_space<vmem>>, %arg7: memref<8x8x128xf32, #tpu.memory_space<vmem>>, %arg8: memref<8x128xf32, #tpu.memory_space<vmem>>, %arg9: memref<8x8x384xf32, #tpu.memory_space<vmem>>, %arg10: memref<8x128xf32, #tpu.memory_space<vmem>>) attributes {dimension_semantics = [#tpu.dimension_semantics<parallel>, #tpu.dimension_semantics<arbitrary>], iteration_bounds = array<i64: 1, 1>, scalar_prefetch = 0 : i64, scratch_operands = 2 : i64, tpu.core_type = #tpu.core_type<tc>, window_params = [{transform_indices = @transform_0, window_bounds = array<i64: 8, 8, 32>}, {pipeline_mode = #tpu.pipeline_mode<synchronous>, transform_indices = @transform_1, window_bounds = array<i64: 32, 384>}, {pipeline_mode = #tpu.pipeline_mode<synchronous>, transform_indices = @transform_2, window_bounds = array<i64: 128, 384>}, {pipeline_mode = #tpu.pipeline_mode<synchronous>, transform_indices = @transform_3, window_bounds = array<i64: 1, 384>}, {pipeline_mode = #tpu.pipeline_mode<synchronous>, transform_indices = @transform_4, window_bounds = array<i64: 1, 128>}, {transform_indices = @transform_5, window_bounds = array<i64: 8, 8, 128>}, {transform_indices = @transform_6, window_bounds = array<i64: 8, 128>}]} {
    %c0_i32 = arith.constant 0 : i32
    %0 = arith.cmpi eq, %arg1, %c0_i32 : i32
    %1 = arith.extui %0 : i1 to i32
    %c0_i32_0 = arith.constant 0 : i32
    %2 = arith.cmpi ne, %1, %c0_i32_0 : i32
    scf.if %2 {
      %cst_77 = arith.constant 0.000000e+00 : f32
      %281 = vector.broadcast %cst_77 : f32 to vector<8x128xf32>
      %c0_78 = arith.constant 0 : index
      %c0_79 = arith.constant 0 : index
      %282 = vector.load %arg10[%c0_78, %c0_79] : memref<8x128xf32, #tpu.memory_space<vmem>>, vector<8x128xf32>
      tpu.vector_store %arg10[%c0_78, %c0_79], %281 {strides = array<i32>} : memref<8x128xf32, #tpu.memory_space<vmem>>, vector<8x128xf32>,
    } else {
    }
    %c0 = arith.constant 0 : index
    %c0_1 = arith.constant 0 : index
    %c0_2 = arith.constant 0 : index
    %3 = vector.load %arg2[%c0, %c0_1, %c0_2] : memref<8x8x32xf32, #tpu.memory_space<vmem>>, vector<8x8x32xf32>
    %4 = vector.shape_cast %3 : vector<8x8x32xf32> to vector<64x32xf32>
    %c0_3 = arith.constant 0 : index
    %c0_4 = arith.constant 0 : index
    %5 = vector.load %arg3[%c0_3, %c0_4] : memref<32x384xf32, #tpu.memory_space<vmem>>, vector<32x384xf32>
    %cst = arith.constant dense<0.000000e+00> : vector<64x384xf32>
    %6 = tpu.matmul %4, %5, %cst {dimension_numbers = #tpu.dot_dimension_numbers<[1], [0], [0], [1], [0, 0, 1, 1], [], []>} : vector<64x32xf32>, vector<32x384xf32>, vector<64x384xf32> -> vector<64x384xf32>
    %c0_5 = arith.constant 0 : index
    %c0_6 = arith.constant 0 : index
    %7 = vector.load %arg5[%c0_5, %c0_6] : memref<1x384xf32, #tpu.memory_space<vmem>>, vector<1x384xf32>
    %8 = vector.broadcast %7 : vector<1x384xf32> to vector<64x384xf32>
    %9 = arith.addf %6, %8 : vector<64x384xf32>
    %10 = vector.shape_cast %9 : vector<64x384xf32> to vector<8x8x384xf32>
    %c0_7 = arith.constant 0 : index
    %c0_8 = arith.constant 0 : index
    %c0_9 = arith.constant 0 : index
    %11 = vector.load %arg9[%c0_7, %c0_8, %c0_9] : memref<8x8x384xf32, #tpu.memory_space<vmem>>, vector<8x8x384xf32>
    tpu.vector_store %arg9[%c0_7, %c0_8, %c0_9], %10 {strides = array<i32>} : memref<8x8x384xf32, #tpu.memory_space<vmem>>, vector<8x8x384xf32>,
    %c0_10 = arith.constant 0 : index
    %c0_11 = arith.constant 0 : index
    %12 = vector.load %arg4[%c0_10, %c0_11] : memref<128x384xf32, #tpu.memory_space<vmem>>, vector<128x384xf32>
    %c0_12 = arith.constant 0 : index
    %c0_13 = arith.constant 0 : index
    %13 = vector.load %arg6[%c0_12, %c0_13] : memref<1x128xf32, #tpu.memory_space<vmem>>, vector<1x128xf32>
    %c0_14 = arith.constant 0 : index
    %c0_15 = arith.constant 0 : index
    %14 = vector.load %arg10[%c0_14, %c0_15] : memref<8x128xf32, #tpu.memory_space<vmem>>, vector<8x128xf32>
    %c0_i32_16 = arith.constant 0 : i32
    %15 = arith.index_cast %c0_i32_16 : i32 to index
    %c0_17 = arith.constant 0 : index
    %c0_18 = arith.constant 0 : index
    %16 = vector.load %arg9[%15, %c0_17, %c0_18] : memref<8x8x384xf32, #tpu.memory_space<vmem>>, vector<1x8x384xf32>
    %17 = vector.shape_cast %16 : vector<1x8x384xf32> to vector<8x384xf32>
    %cst_19 = arith.constant dense<0.000000e+00> : vector<8x384xf32>
    %18 = tpu.matmul %14, %12, %cst_19 {dimension_numbers = #tpu.dot_dimension_numbers<[1], [0], [0], [1], [0, 0, 1, 1], [], []>} : vector<8x128xf32>, vector<128x384xf32>, vector<8x384xf32> -> vector<8x384xf32>
    %19 = vector.extract_strided_slice %17 {offsets = [0, 0], sizes = [8, 256], strides = [1, 1]} : vector<8x384xf32> to vector<8x256xf32>
    %20 = vector.extract_strided_slice %18 {offsets = [0, 0], sizes = [8, 256], strides = [1, 1]} : vector<8x384xf32> to vector<8x256xf32>
    %21 = arith.addf %19, %20 : vector<8x256xf32>
    %22 = vector.extract_strided_slice %21 {offsets = [0, 0], sizes = [8, 128], strides = [1, 1]} : vector<8x256xf32> to vector<8x128xf32>
    %23 = arith.negf %22 : vector<8x128xf32>
    %24 = math.exp %23 : vector<8x128xf32>
    %cst_20 = arith.constant 1.000000e+00 : f32
    %25 = vector.broadcast %cst_20 : f32 to vector<8x128xf32>
    %26 = arith.addf %25, %24 : vector<8x128xf32>
    %27 = arith.divf %25, %26 : vector<8x128xf32>
    %28 = vector.extract_strided_slice %21 {offsets = [0, 128], sizes = [8, 128], strides = [1, 1]} : vector<8x256xf32> to vector<8x128xf32>
    %29 = arith.negf %28 : vector<8x128xf32>
    %30 = math.exp %29 : vector<8x128xf32>
    %cst_21 = arith.constant 1.000000e+00 : f32
    %31 = vector.broadcast %cst_21 : f32 to vector<8x128xf32>
    %32 = arith.addf %31, %30 : vector<8x128xf32>
    %33 = arith.divf %31, %32 : vector<8x128xf32>
    %34 = vector.extract_strided_slice %17 {offsets = [0, 256], sizes = [8, 128], strides = [1, 1]} : vector<8x384xf32> to vector<8x128xf32>
    %35 = vector.extract_strided_slice %18 {offsets = [0, 256], sizes = [8, 128], strides = [1, 1]} : vector<8x384xf32> to vector<8x128xf32>
    %36 = vector.broadcast %13 : vector<1x128xf32> to vector<8x128xf32>
    %37 = arith.addf %35, %36 : vector<8x128xf32>
    %38 = arith.mulf %27, %37 : vector<8x128xf32>
    %39 = arith.addf %34, %38 : vector<8x128xf32>
    %40 = math.tanh %39 : vector<8x128xf32>
    %41 = arith.subf %14, %40 : vector<8x128xf32>
    %42 = arith.mulf %33, %41 : vector<8x128xf32>
    %43 = arith.addf %40, %42 : vector<8x128xf32>
    %44 = arith.index_cast %c0_i32_16 : i32 to index
    %c0_22 = arith.constant 0 : index
    %c0_23 = arith.constant 0 : index
    %45 = vector.load %arg7[%44, %c0_22, %c0_23] : memref<8x8x128xf32, #tpu.memory_space<vmem>>, vector<1x8x128xf32>
    %46 = vector.shape_cast %45 : vector<1x8x128xf32> to vector<8x128xf32>
    %47 = vector.shape_cast %43 : vector<8x128xf32> to vector<1x8x128xf32>
    tpu.vector_store %arg7[%44, %c0_22, %c0_23], %47 {strides = array<i32>} : memref<8x8x128xf32, #tpu.memory_space<vmem>>, vector<1x8x128xf32>,
    %c1_i32 = arith.constant 1 : i32
    %48 = arith.index_cast %c1_i32 : i32 to index
    %c0_24 = arith.constant 0 : index
    %c0_25 = arith.constant 0 : index
    %49 = vector.load %arg9[%48, %c0_24, %c0_25] : memref<8x8x384xf32, #tpu.memory_space<vmem>>, vector<1x8x384xf32>
    %50 = vector.shape_cast %49 : vector<1x8x384xf32> to vector<8x384xf32>
    %cst_26 = arith.constant dense<0.000000e+00> : vector<8x384xf32>
    %51 = tpu.matmul %43, %12, %cst_26 {dimension_numbers = #tpu.dot_dimension_numbers<[1], [0], [0], [1], [0, 0, 1, 1], [], []>} : vector<8x128xf32>, vector<128x384xf32>, vector<8x384xf32> -> vector<8x384xf32>
    %52 = vector.extract_strided_slice %50 {offsets = [0, 0], sizes = [8, 256], strides = [1, 1]} : vector<8x384xf32> to vector<8x256xf32>
    %53 = vector.extract_strided_slice %51 {offsets = [0, 0], sizes = [8, 256], strides = [1, 1]} : vector<8x384xf32> to vector<8x256xf32>
    %54 = arith.addf %52, %53 : vector<8x256xf32>
    %55 = vector.extract_strided_slice %54 {offsets = [0, 0], sizes = [8, 128], strides = [1, 1]} : vector<8x256xf32> to vector<8x128xf32>
    %56 = arith.negf %55 : vector<8x128xf32>
    %57 = math.exp %56 : vector<8x128xf32>
    %cst_27 = arith.constant 1.000000e+00 : f32
    %58 = vector.broadcast %cst_27 : f32 to vector<8x128xf32>
    %59 = arith.addf %58, %57 : vector<8x128xf32>
    %60 = arith.divf %58, %59 : vector<8x128xf32>
    %61 = vector.extract_strided_slice %54 {offsets = [0, 128], sizes = [8, 128], strides = [1, 1]} : vector<8x256xf32> to vector<8x128xf32>
    %62 = arith.negf %61 : vector<8x128xf32>
    %63 = math.exp %62 : vector<8x128xf32>
    %cst_28 = arith.constant 1.000000e+00 : f32
    %64 = vector.broadcast %cst_28 : f32 to vector<8x128xf32>
    %65 = arith.addf %64, %63 : vector<8x128xf32>
    %66 = arith.divf %64, %65 : vector<8x128xf32>
    %67 = vector.extract_strided_slice %50 {offsets = [0, 256], sizes = [8, 128], strides = [1, 1]} : vector<8x384xf32> to vector<8x128xf32>
    %68 = vector.extract_strided_slice %51 {offsets = [0, 256], sizes = [8, 128], strides = [1, 1]} : vector<8x384xf32> to vector<8x128xf32>
    %69 = vector.broadcast %13 : vector<1x128xf32> to vector<8x128xf32>
    %70 = arith.addf %68, %69 : vector<8x128xf32>
    %71 = arith.mulf %60, %70 : vector<8x128xf32>
    %72 = arith.addf %67, %71 : vector<8x128xf32>
    %73 = math.tanh %72 : vector<8x128xf32>
    %74 = arith.subf %43, %73 : vector<8x128xf32>
    %75 = arith.mulf %66, %74 : vector<8x128xf32>
    %76 = arith.addf %73, %75 : vector<8x128xf32>
    %77 = arith.index_cast %c1_i32 : i32 to index
    %c0_29 = arith.constant 0 : index
    %c0_30 = arith.constant 0 : index
    %78 = vector.load %arg7[%77, %c0_29, %c0_30] : memref<8x8x128xf32, #tpu.memory_space<vmem>>, vector<1x8x128xf32>
    %79 = vector.shape_cast %78 : vector<1x8x128xf32> to vector<8x128xf32>
    %80 = vector.shape_cast %76 : vector<8x128xf32> to vector<1x8x128xf32>
    tpu.vector_store %arg7[%77, %c0_29, %c0_30], %80 {strides = array<i32>} : memref<8x8x128xf32, #tpu.memory_space<vmem>>, vector<1x8x128xf32>,
    %c2_i32 = arith.constant 2 : i32
    %81 = arith.index_cast %c2_i32 : i32 to index
    %c0_31 = arith.constant 0 : index
    %c0_32 = arith.constant 0 : index
    %82 = vector.load %arg9[%81, %c0_31, %c0_32] : memref<8x8x384xf32, #tpu.memory_space<vmem>>, vector<1x8x384xf32>
    %83 = vector.shape_cast %82 : vector<1x8x384xf32> to vector<8x384xf32>
    %cst_33 = arith.constant dense<0.000000e+00> : vector<8x384xf32>
    %84 = tpu.matmul %76, %12, %cst_33 {dimension_numbers = #tpu.dot_dimension_numbers<[1], [0], [0], [1], [0, 0, 1, 1], [], []>} : vector<8x128xf32>, vector<128x384xf32>, vector<8x384xf32> -> vector<8x384xf32>
    %85 = vector.extract_strided_slice %83 {offsets = [0, 0], sizes = [8, 256], strides = [1, 1]} : vector<8x384xf32> to vector<8x256xf32>
    %86 = vector.extract_strided_slice %84 {offsets = [0, 0], sizes = [8, 256], strides = [1, 1]} : vector<8x384xf32> to vector<8x256xf32>
    %87 = arith.addf %85, %86 : vector<8x256xf32>
    %88 = vector.extract_strided_slice %87 {offsets = [0, 0], sizes = [8, 128], strides = [1, 1]} : vector<8x256xf32> to vector<8x128xf32>
    %89 = arith.negf %88 : vector<8x128xf32>
    %90 = math.exp %89 : vector<8x128xf32>
    %cst_34 = arith.constant 1.000000e+00 : f32
    %91 = vector.broadcast %cst_34 : f32 to vector<8x128xf32>
    %92 = arith.addf %91, %90 : vector<8x128xf32>
    %93 = arith.divf %91, %92 : vector<8x128xf32>
    %94 = vector.extract_strided_slice %87 {offsets = [0, 128], sizes = [8, 128], strides = [1, 1]} : vector<8x256xf32> to vector<8x128xf32>
    %95 = arith.negf %94 : vector<8x128xf32>
    %96 = math.exp %95 : vector<8x128xf32>
    %cst_35 = arith.constant 1.000000e+00 : f32
    %97 = vector.broadcast %cst_35 : f32 to vector<8x128xf32>
    %98 = arith.addf %97, %96 : vector<8x128xf32>
    %99 = arith.divf %97, %98 : vector<8x128xf32>
    %100 = vector.extract_strided_slice %83 {offsets = [0, 256], sizes = [8, 128], strides = [1, 1]} : vector<8x384xf32> to vector<8x128xf32>
    %101 = vector.extract_strided_slice %84 {offsets = [0, 256], sizes = [8, 128], strides = [1, 1]} : vector<8x384xf32> to vector<8x128xf32>
    %102 = vector.broadcast %13 : vector<1x128xf32> to vector<8x128xf32>
    %103 = arith.addf %101, %102 : vector<8x128xf32>
    %104 = arith.mulf %93, %103 : vector<8x128xf32>
    %105 = arith.addf %100, %104 : vector<8x128xf32>
    %106 = math.tanh %105 : vector<8x128xf32>
    %107 = arith.subf %76, %106 : vector<8x128xf32>
    %108 = arith.mulf %99, %107 : vector<8x128xf32>
    %109 = arith.addf %106, %108 : vector<8x128xf32>
    %110 = arith.index_cast %c2_i32 : i32 to index
    %c0_36 = arith.constant 0 : index
    %c0_37 = arith.constant 0 : index
    %111 = vector.load %arg7[%110, %c0_36, %c0_37] : memref<8x8x128xf32, #tpu.memory_space<vmem>>, vector<1x8x128xf32>
    %112 = vector.shape_cast %111 : vector<1x8x128xf32> to vector<8x128xf32>
    %113 = vector.shape_cast %109 : vector<8x128xf32> to vector<1x8x128xf32>
    tpu.vector_store %arg7[%110, %c0_36, %c0_37], %113 {strides = array<i32>} : memref<8x8x128xf32, #tpu.memory_space<vmem>>, vector<1x8x128xf32>,
    %c3_i32 = arith.constant 3 : i32
    %114 = arith.index_cast %c3_i32 : i32 to index
    %c0_38 = arith.constant 0 : index
    %c0_39 = arith.constant 0 : index
    %115 = vector.load %arg9[%114, %c0_38, %c0_39] : memref<8x8x384xf32, #tpu.memory_space<vmem>>, vector<1x8x384xf32>
    %116 = vector.shape_cast %115 : vector<1x8x384xf32> to vector<8x384xf32>
    %cst_40 = arith.constant dense<0.000000e+00> : vector<8x384xf32>
    %117 = tpu.matmul %109, %12, %cst_40 {dimension_numbers = #tpu.dot_dimension_numbers<[1], [0], [0], [1], [0, 0, 1, 1], [], []>} : vector<8x128xf32>, vector<128x384xf32>, vector<8x384xf32> -> vector<8x384xf32>
    %118 = vector.extract_strided_slice %116 {offsets = [0, 0], sizes = [8, 256], strides = [1, 1]} : vector<8x384xf32> to vector<8x256xf32>
    %119 = vector.extract_strided_slice %117 {offsets = [0, 0], sizes = [8, 256], strides = [1, 1]} : vector<8x384xf32> to vector<8x256xf32>
    %120 = arith.addf %118, %119 : vector<8x256xf32>
    %121 = vector.extract_strided_slice %120 {offsets = [0, 0], sizes = [8, 128], strides = [1, 1]} : vector<8x256xf32> to vector<8x128xf32>
    %122 = arith.negf %121 : vector<8x128xf32>
    %123 = math.exp %122 : vector<8x128xf32>
    %cst_41 = arith.constant 1.000000e+00 : f32
    %124 = vector.broadcast %cst_41 : f32 to vector<8x128xf32>
    %125 = arith.addf %124, %123 : vector<8x128xf32>
    %126 = arith.divf %124, %125 : vector<8x128xf32>
    %127 = vector.extract_strided_slice %120 {offsets = [0, 128], sizes = [8, 128], strides = [1, 1]} : vector<8x256xf32> to vector<8x128xf32>
    %128 = arith.negf %127 : vector<8x128xf32>
    %129 = math.exp %128 : vector<8x128xf32>
    %cst_42 = arith.constant 1.000000e+00 : f32
    %130 = vector.broadcast %cst_42 : f32 to vector<8x128xf32>
    %131 = arith.addf %130, %129 : vector<8x128xf32>
    %132 = arith.divf %130, %131 : vector<8x128xf32>
    %133 = vector.extract_strided_slice %116 {offsets = [0, 256], sizes = [8, 128], strides = [1, 1]} : vector<8x384xf32> to vector<8x128xf32>
    %134 = vector.extract_strided_slice %117 {offsets = [0, 256], sizes = [8, 128], strides = [1, 1]} : vector<8x384xf32> to vector<8x128xf32>
    %135 = vector.broadcast %13 : vector<1x128xf32> to vector<8x128xf32>
    %136 = arith.addf %134, %135 : vector<8x128xf32>
    %137 = arith.mulf %126, %136 : vector<8x128xf32>
    %138 = arith.addf %133, %137 : vector<8x128xf32>
    %139 = math.tanh %138 : vector<8x128xf32>
    %140 = arith.subf %109, %139 : vector<8x128xf32>
    %141 = arith.mulf %132, %140 : vector<8x128xf32>
    %142 = arith.addf %139, %141 : vector<8x128xf32>
    %143 = arith.index_cast %c3_i32 : i32 to index
    %c0_43 = arith.constant 0 : index
    %c0_44 = arith.constant 0 : index
    %144 = vector.load %arg7[%143, %c0_43, %c0_44] : memref<8x8x128xf32, #tpu.memory_space<vmem>>, vector<1x8x128xf32>
    %145 = vector.shape_cast %144 : vector<1x8x128xf32> to vector<8x128xf32>
    %146 = vector.shape_cast %142 : vector<8x128xf32> to vector<1x8x128xf32>
    tpu.vector_store %arg7[%143, %c0_43, %c0_44], %146 {strides = array<i32>} : memref<8x8x128xf32, #tpu.memory_space<vmem>>, vector<1x8x128xf32>,
    %c4_i32 = arith.constant 4 : i32
    %147 = arith.index_cast %c4_i32 : i32 to index
    %c0_45 = arith.constant 0 : index
    %c0_46 = arith.constant 0 : index
    %148 = vector.load %arg9[%147, %c0_45, %c0_46] : memref<8x8x384xf32, #tpu.memory_space<vmem>>, vector<1x8x384xf32>
    %149 = vector.shape_cast %148 : vector<1x8x384xf32> to vector<8x384xf32>
    %cst_47 = arith.constant dense<0.000000e+00> : vector<8x384xf32>
    %150 = tpu.matmul %142, %12, %cst_47 {dimension_numbers = #tpu.dot_dimension_numbers<[1], [0], [0], [1], [0, 0, 1, 1], [], []>} : vector<8x128xf32>, vector<128x384xf32>, vector<8x384xf32> -> vector<8x384xf32>
    %151 = vector.extract_strided_slice %149 {offsets = [0, 0], sizes = [8, 256], strides = [1, 1]} : vector<8x384xf32> to vector<8x256xf32>
    %152 = vector.extract_strided_slice %150 {offsets = [0, 0], sizes = [8, 256], strides = [1, 1]} : vector<8x384xf32> to vector<8x256xf32>
    %153 = arith.addf %151, %152 : vector<8x256xf32>
    %154 = vector.extract_strided_slice %153 {offsets = [0, 0], sizes = [8, 128], strides = [1, 1]} : vector<8x256xf32> to vector<8x128xf32>
    %155 = arith.negf %154 : vector<8x128xf32>
    %156 = math.exp %155 : vector<8x128xf32>
    %cst_48 = arith.constant 1.000000e+00 : f32
    %157 = vector.broadcast %cst_48 : f32 to vector<8x128xf32>
    %158 = arith.addf %157, %156 : vector<8x128xf32>
    %159 = arith.divf %157, %158 : vector<8x128xf32>
    %160 = vector.extract_strided_slice %153 {offsets = [0, 128], sizes = [8, 128], strides = [1, 1]} : vector<8x256xf32> to vector<8x128xf32>
    %161 = arith.negf %160 : vector<8x128xf32>
    %162 = math.exp %161 : vector<8x128xf32>
    %cst_49 = arith.constant 1.000000e+00 : f32
    %163 = vector.broadcast %cst_49 : f32 to vector<8x128xf32>
    %164 = arith.addf %163, %162 : vector<8x128xf32>
    %165 = arith.divf %163, %164 : vector<8x128xf32>
    %166 = vector.extract_strided_slice %149 {offsets = [0, 256], sizes = [8, 128], strides = [1, 1]} : vector<8x384xf32> to vector<8x128xf32>
    %167 = vector.extract_strided_slice %150 {offsets = [0, 256], sizes = [8, 128], strides = [1, 1]} : vector<8x384xf32> to vector<8x128xf32>
    %168 = vector.broadcast %13 : vector<1x128xf32> to vector<8x128xf32>
    %169 = arith.addf %167, %168 : vector<8x128xf32>
    %170 = arith.mulf %159, %169 : vector<8x128xf32>
    %171 = arith.addf %166, %170 : vector<8x128xf32>
    %172 = math.tanh %171 : vector<8x128xf32>
    %173 = arith.subf %142, %172 : vector<8x128xf32>
    %174 = arith.mulf %165, %173 : vector<8x128xf32>
    %175 = arith.addf %172, %174 : vector<8x128xf32>
    %176 = arith.index_cast %c4_i32 : i32 to index
    %c0_50 = arith.constant 0 : index
    %c0_51 = arith.constant 0 : index
    %177 = vector.load %arg7[%176, %c0_50, %c0_51] : memref<8x8x128xf32, #tpu.memory_space<vmem>>, vector<1x8x128xf32>
    %178 = vector.shape_cast %177 : vector<1x8x128xf32> to vector<8x128xf32>
    %179 = vector.shape_cast %175 : vector<8x128xf32> to vector<1x8x128xf32>
    tpu.vector_store %arg7[%176, %c0_50, %c0_51], %179 {strides = array<i32>} : memref<8x8x128xf32, #tpu.memory_space<vmem>>, vector<1x8x128xf32>,
    %c5_i32 = arith.constant 5 : i32
    %180 = arith.index_cast %c5_i32 : i32 to index
    %c0_52 = arith.constant 0 : index
    %c0_53 = arith.constant 0 : index
    %181 = vector.load %arg9[%180, %c0_52, %c0_53] : memref<8x8x384xf32, #tpu.memory_space<vmem>>, vector<1x8x384xf32>
    %182 = vector.shape_cast %181 : vector<1x8x384xf32> to vector<8x384xf32>
    %cst_54 = arith.constant dense<0.000000e+00> : vector<8x384xf32>
    %183 = tpu.matmul %175, %12, %cst_54 {dimension_numbers = #tpu.dot_dimension_numbers<[1], [0], [0], [1], [0, 0, 1, 1], [], []>} : vector<8x128xf32>, vector<128x384xf32>, vector<8x384xf32> -> vector<8x384xf32>
    %184 = vector.extract_strided_slice %182 {offsets = [0, 0], sizes = [8, 256], strides = [1, 1]} : vector<8x384xf32> to vector<8x256xf32>
    %185 = vector.extract_strided_slice %183 {offsets = [0, 0], sizes = [8, 256], strides = [1, 1]} : vector<8x384xf32> to vector<8x256xf32>
    %186 = arith.addf %184, %185 : vector<8x256xf32>
    %187 = vector.extract_strided_slice %186 {offsets = [0, 0], sizes = [8, 128], strides = [1, 1]} : vector<8x256xf32> to vector<8x128xf32>
    %188 = arith.negf %187 : vector<8x128xf32>
    %189 = math.exp %188 : vector<8x128xf32>
    %cst_55 = arith.constant 1.000000e+00 : f32
    %190 = vector.broadcast %cst_55 : f32 to vector<8x128xf32>
    %191 = arith.addf %190, %189 : vector<8x128xf32>
    %192 = arith.divf %190, %191 : vector<8x128xf32>
    %193 = vector.extract_strided_slice %186 {offsets = [0, 128], sizes = [8, 128], strides = [1, 1]} : vector<8x256xf32> to vector<8x128xf32>
    %194 = arith.negf %193 : vector<8x128xf32>
    %195 = math.exp %194 : vector<8x128xf32>
    %cst_56 = arith.constant 1.000000e+00 : f32
    %196 = vector.broadcast %cst_56 : f32 to vector<8x128xf32>
    %197 = arith.addf %196, %195 : vector<8x128xf32>
    %198 = arith.divf %196, %197 : vector<8x128xf32>
    %199 = vector.extract_strided_slice %182 {offsets = [0, 256], sizes = [8, 128], strides = [1, 1]} : vector<8x384xf32> to vector<8x128xf32>
    %200 = vector.extract_strided_slice %183 {offsets = [0, 256], sizes = [8, 128], strides = [1, 1]} : vector<8x384xf32> to vector<8x128xf32>
    %201 = vector.broadcast %13 : vector<1x128xf32> to vector<8x128xf32>
    %202 = arith.addf %200, %201 : vector<8x128xf32>
    %203 = arith.mulf %192, %202 : vector<8x128xf32>
    %204 = arith.addf %199, %203 : vector<8x128xf32>
    %205 = math.tanh %204 : vector<8x128xf32>
    %206 = arith.subf %175, %205 : vector<8x128xf32>
    %207 = arith.mulf %198, %206 : vector<8x128xf32>
    %208 = arith.addf %205, %207 : vector<8x128xf32>
    %209 = arith.index_cast %c5_i32 : i32 to index
    %c0_57 = arith.constant 0 : index
    %c0_58 = arith.constant 0 : index
    %210 = vector.load %arg7[%209, %c0_57, %c0_58] : memref<8x8x128xf32, #tpu.memory_space<vmem>>, vector<1x8x128xf32>
    %211 = vector.shape_cast %210 : vector<1x8x128xf32> to vector<8x128xf32>
    %212 = vector.shape_cast %208 : vector<8x128xf32> to vector<1x8x128xf32>
    tpu.vector_store %arg7[%209, %c0_57, %c0_58], %212 {strides = array<i32>} : memref<8x8x128xf32, #tpu.memory_space<vmem>>, vector<1x8x128xf32>,
    %c6_i32 = arith.constant 6 : i32
    %213 = arith.index_cast %c6_i32 : i32 to index
    %c0_59 = arith.constant 0 : index
    %c0_60 = arith.constant 0 : index
    %214 = vector.load %arg9[%213, %c0_59, %c0_60] : memref<8x8x384xf32, #tpu.memory_space<vmem>>, vector<1x8x384xf32>
    %215 = vector.shape_cast %214 : vector<1x8x384xf32> to vector<8x384xf32>
    %cst_61 = arith.constant dense<0.000000e+00> : vector<8x384xf32>
    %216 = tpu.matmul %208, %12, %cst_61 {dimension_numbers = #tpu.dot_dimension_numbers<[1], [0], [0], [1], [0, 0, 1, 1], [], []>} : vector<8x128xf32>, vector<128x384xf32>, vector<8x384xf32> -> vector<8x384xf32>
    %217 = vector.extract_strided_slice %215 {offsets = [0, 0], sizes = [8, 256], strides = [1, 1]} : vector<8x384xf32> to vector<8x256xf32>
    %218 = vector.extract_strided_slice %216 {offsets = [0, 0], sizes = [8, 256], strides = [1, 1]} : vector<8x384xf32> to vector<8x256xf32>
    %219 = arith.addf %217, %218 : vector<8x256xf32>
    %220 = vector.extract_strided_slice %219 {offsets = [0, 0], sizes = [8, 128], strides = [1, 1]} : vector<8x256xf32> to vector<8x128xf32>
    %221 = arith.negf %220 : vector<8x128xf32>
    %222 = math.exp %221 : vector<8x128xf32>
    %cst_62 = arith.constant 1.000000e+00 : f32
    %223 = vector.broadcast %cst_62 : f32 to vector<8x128xf32>
    %224 = arith.addf %223, %222 : vector<8x128xf32>
    %225 = arith.divf %223, %224 : vector<8x128xf32>
    %226 = vector.extract_strided_slice %219 {offsets = [0, 128], sizes = [8, 128], strides = [1, 1]} : vector<8x256xf32> to vector<8x128xf32>
    %227 = arith.negf %226 : vector<8x128xf32>
    %228 = math.exp %227 : vector<8x128xf32>
    %cst_63 = arith.constant 1.000000e+00 : f32
    %229 = vector.broadcast %cst_63 : f32 to vector<8x128xf32>
    %230 = arith.addf %229, %228 : vector<8x128xf32>
    %231 = arith.divf %229, %230 : vector<8x128xf32>
    %232 = vector.extract_strided_slice %215 {offsets = [0, 256], sizes = [8, 128], strides = [1, 1]} : vector<8x384xf32> to vector<8x128xf32>
    %233 = vector.extract_strided_slice %216 {offsets = [0, 256], sizes = [8, 128], strides = [1, 1]} : vector<8x384xf32> to vector<8x128xf32>
    %234 = vector.broadcast %13 : vector<1x128xf32> to vector<8x128xf32>
    %235 = arith.addf %233, %234 : vector<8x128xf32>
    %236 = arith.mulf %225, %235 : vector<8x128xf32>
    %237 = arith.addf %232, %236 : vector<8x128xf32>
    %238 = math.tanh %237 : vector<8x128xf32>
    %239 = arith.subf %208, %238 : vector<8x128xf32>
    %240 = arith.mulf %231, %239 : vector<8x128xf32>
    %241 = arith.addf %238, %240 : vector<8x128xf32>
    %242 = arith.index_cast %c6_i32 : i32 to index
    %c0_64 = arith.constant 0 : index
    %c0_65 = arith.constant 0 : index
    %243 = vector.load %arg7[%242, %c0_64, %c0_65] : memref<8x8x128xf32, #tpu.memory_space<vmem>>, vector<1x8x128xf32>
    %244 = vector.shape_cast %243 : vector<1x8x128xf32> to vector<8x128xf32>
    %245 = vector.shape_cast %241 : vector<8x128xf32> to vector<1x8x128xf32>
    tpu.vector_store %arg7[%242, %c0_64, %c0_65], %245 {strides = array<i32>} : memref<8x8x128xf32, #tpu.memory_space<vmem>>, vector<1x8x128xf32>,
    %c7_i32 = arith.constant 7 : i32
    %246 = arith.index_cast %c7_i32 : i32 to index
    %c0_66 = arith.constant 0 : index
    %c0_67 = arith.constant 0 : index
    %247 = vector.load %arg9[%246, %c0_66, %c0_67] : memref<8x8x384xf32, #tpu.memory_space<vmem>>, vector<1x8x384xf32>
    %248 = vector.shape_cast %247 : vector<1x8x384xf32> to vector<8x384xf32>
    %cst_68 = arith.constant dense<0.000000e+00> : vector<8x384xf32>
    %249 = tpu.matmul %241, %12, %cst_68 {dimension_numbers = #tpu.dot_dimension_numbers<[1], [0], [0], [1], [0, 0, 1, 1], [], []>} : vector<8x128xf32>, vector<128x384xf32>, vector<8x384xf32> -> vector<8x384xf32>
    %250 = vector.extract_strided_slice %248 {offsets = [0, 0], sizes = [8, 256], strides = [1, 1]} : vector<8x384xf32> to vector<8x256xf32>
    %251 = vector.extract_strided_slice %249 {offsets = [0, 0], sizes = [8, 256], strides = [1, 1]} : vector<8x384xf32> to vector<8x256xf32>
    %252 = arith.addf %250, %251 : vector<8x256xf32>
    %253 = vector.extract_strided_slice %252 {offsets = [0, 0], sizes = [8, 128], strides = [1, 1]} : vector<8x256xf32> to vector<8x128xf32>
    %254 = arith.negf %253 : vector<8x128xf32>
    %255 = math.exp %254 : vector<8x128xf32>
    %cst_69 = arith.constant 1.000000e+00 : f32
    %256 = vector.broadcast %cst_69 : f32 to vector<8x128xf32>
    %257 = arith.addf %256, %255 : vector<8x128xf32>
    %258 = arith.divf %256, %257 : vector<8x128xf32>
    %259 = vector.extract_strided_slice %252 {offsets = [0, 128], sizes = [8, 128], strides = [1, 1]} : vector<8x256xf32> to vector<8x128xf32>
    %260 = arith.negf %259 : vector<8x128xf32>
    %261 = math.exp %260 : vector<8x128xf32>
    %cst_70 = arith.constant 1.000000e+00 : f32
    %262 = vector.broadcast %cst_70 : f32 to vector<8x128xf32>
    %263 = arith.addf %262, %261 : vector<8x128xf32>
    %264 = arith.divf %262, %263 : vector<8x128xf32>
    %265 = vector.extract_strided_slice %248 {offsets = [0, 256], sizes = [8, 128], strides = [1, 1]} : vector<8x384xf32> to vector<8x128xf32>
    %266 = vector.extract_strided_slice %249 {offsets = [0, 256], sizes = [8, 128], strides = [1, 1]} : vector<8x384xf32> to vector<8x128xf32>
    %267 = vector.broadcast %13 : vector<1x128xf32> to vector<8x128xf32>
    %268 = arith.addf %266, %267 : vector<8x128xf32>
    %269 = arith.mulf %258, %268 : vector<8x128xf32>
    %270 = arith.addf %265, %269 : vector<8x128xf32>
    %271 = math.tanh %270 : vector<8x128xf32>
    %272 = arith.subf %241, %271 : vector<8x128xf32>
    %273 = arith.mulf %264, %272 : vector<8x128xf32>
    %274 = arith.addf %271, %273 : vector<8x128xf32>
    %275 = arith.index_cast %c7_i32 : i32 to index
    %c0_71 = arith.constant 0 : index
    %c0_72 = arith.constant 0 : index
    %276 = vector.load %arg7[%275, %c0_71, %c0_72] : memref<8x8x128xf32, #tpu.memory_space<vmem>>, vector<1x8x128xf32>
    %277 = vector.shape_cast %276 : vector<1x8x128xf32> to vector<8x128xf32>
    %278 = vector.shape_cast %274 : vector<8x128xf32> to vector<1x8x128xf32>
    tpu.vector_store %arg7[%275, %c0_71, %c0_72], %278 {strides = array<i32>} : memref<8x8x128xf32, #tpu.memory_space<vmem>>, vector<1x8x128xf32>,
    %c8_i32 = arith.constant 8 : i32
    %c0_73 = arith.constant 0 : index
    %c0_74 = arith.constant 0 : index
    %279 = vector.load %arg10[%c0_73, %c0_74] : memref<8x128xf32, #tpu.memory_space<vmem>>, vector<8x128xf32>
    tpu.vector_store %arg10[%c0_73, %c0_74], %274 {strides = array<i32>} : memref<8x128xf32, #tpu.memory_space<vmem>>, vector<8x128xf32>,
    %c0_75 = arith.constant 0 : index
    %c0_76 = arith.constant 0 : index
    %280 = vector.load %arg8[%c0_75, %c0_76] : memref<8x128xf32, #tpu.memory_space<vmem>>, vector<8x128xf32>
    tpu.vector_store %arg8[%c0_75, %c0_76], %274 {strides = array<i32>} : memref<8x128xf32, #tpu.memory_space<vmem>>, vector<8x128xf32>,
    return
  }
  func.func @transform_0(%arg0: i32, %arg1: i32) -> (i32, i32, i32) {
    %c0_i32 = arith.constant 0 : i32
    %c0_i32_0 = arith.constant 0 : i32
    return %arg1, %arg0, %c0_i32 : i32, i32, i32
  }
  func.func @transform_1(%arg0: i32, %arg1: i32) -> (i32, i32) {
    %c0_i32 = arith.constant 0 : i32
    %c0_i32_0 = arith.constant 0 : i32
    %c0_i32_1 = arith.constant 0 : i32
    return %c0_i32, %c0_i32_0 : i32, i32
  }
  func.func @transform_2(%arg0: i32, %arg1: i32) -> (i32, i32) {
    %c0_i32 = arith.constant 0 : i32
    %c0_i32_0 = arith.constant 0 : i32
    %c0_i32_1 = arith.constant 0 : i32
    return %c0_i32, %c0_i32_0 : i32, i32
  }
  func.func @transform_3(%arg0: i32, %arg1: i32) -> (i32, i32) {
    %c0_i32 = arith.constant 0 : i32
    %c0_i32_0 = arith.constant 0 : i32
    %c0_i32_1 = arith.constant 0 : i32
    return %c0_i32, %c0_i32_0 : i32, i32
  }
  func.func @transform_4(%arg0: i32, %arg1: i32) -> (i32, i32) {
    %c0_i32 = arith.constant 0 : i32
    %c0_i32_0 = arith.constant 0 : i32
    %c0_i32_1 = arith.constant 0 : i32
    return %c0_i32, %c0_i32_0 : i32, i32
  }
  func.func @transform_5(%arg0: i32, %arg1: i32) -> (i32, i32, i32) {
    %c0_i32 = arith.constant 0 : i32
    %c0_i32_0 = arith.constant 0 : i32
    return %arg1, %arg0, %c0_i32 : i32, i32, i32
  }
  func.func @transform_6(%arg0: i32, %arg1: i32) -> (i32, i32) {
    %c0_i32 = arith.constant 0 : i32
    %c0_i32_0 = arith.constant 0 : i32
    return %arg0, %c0_i32 : i32, i32
  }
}

</mosaic_0001>

<bundles_post_ra>
// kernel: tpu_custom_call.1
= control target key start
LH: loop header
LB: loop body
LE: loop exit
PB: predicated region body
PF: predicated region fallthrough
CT: control target
= control target key end

     0   :  { %12 = vsyncpa [#allocation5], 0  ;;  %s3492_s0 = inlined_call_operand.hbm [shape: f32[8,8,32], index: 0, kind: input, shape index: {}]   ;;  %s3493_s1 = inlined_call_operand.hbm [shape: f32[32,384], index: 1, kind: input, shape index: {}]   ;;  %s3494_s2 = inlined_call_operand.hbm [shape: f32[128,384], index: 2, kind: input, shape index: {}]   ;;  %s3495_s3 = inlined_call_operand.vmem [shape: f32[1,384], index: 3, kind: input, shape index: {}]   ;;  %s3496_s4 = inlined_call_operand.vmem [shape: f32[1,128], index: 4, kind: input, shape index: {}]   ;;  %s3497_s5 = inlined_call_operand.hbm [shape: f32[8,8,128], index: 5, kind: output, shape index: {0}]   ;;  %s3498_s6 = inlined_call_operand.hbm [shape: f32[8,128], index: 6, kind: output, shape index: {1}]  }
   0x1   :  { %13 = vsyncpa [#allocation8], 0 }
   0x2   :  { %14 = vsyncpa [#allocation6], 0 }
   0x3   :  { %15 = vsyncpa [#allocation12], 0  ;;  %s2535_s21 = smov [#allocation7]  }
   0x4   :  { %s33_s22 = sshll.u32 %s2535_s21, 4  ;;  %s34_s22 = int_to_ptr.vmem [resolvable:$true] %s33_s22 }
   0x5   :  { %s2435_s23 = scalar_lea.vmem %s34_s22, 1536  ;;  %p2440_p1 = scmp.lt.s32.totalorder %s34_s22, %s34_s22 }
   0x6   :  { %p2436_p0 = scmp.ne.s32.totalorder %s34_s22, %s2435_s23  ;;  %p2441_p2 = scmp.lt.s32.totalorder %s2435_s23, %s2435_s23 }
   0x8   :  { %p2442_p3 = por %p2441_p2, %p2440_p1 }
   0xa   :  { %p2443_p4 = pnand %p2442_p3, %p2436_p0 }
   0xc   :  { %2446 = shalt.err (!%p2443_p4)
}
   0xd   :  { %s2536_s24 = smov 384   ;;  %s2537_s25 = smov 24  }
   0xe   :  { %39 = dma.hbm_to_vmem [thread:$0]  %s3493_s1, 1536, %s34_s22, [#allocation8], %s2536_s24, %s2536_s24, %s2537_s25  }
   0xf   :  { %s2538_s28 = smov [#allocation4]  }
  0x10   :  { %s21_s29 = sshll.u32 %s2538_s28, 4  ;;  %s22_s29 = int_to_ptr.vmem [resolvable:$true] %s21_s29 }
  0x11   :  { %s2455_s30 = scalar_lea.vmem %s22_s29, 1024  ;;  %p2460_p6 = scmp.lt.s32.totalorder %s22_s29, %s22_s29 }
  0x12   :  { %p2456_p5 = scmp.ne.s32.totalorder %s22_s29, %s2455_s30  ;;  %p2461_p7 = scmp.lt.s32.totalorder %s2455_s30, %s2455_s30 }
  0x14   :  { %p2462_p8 = por %p2461_p7, %p2460_p6 }
  0x16   :  { %p2463_p9 = pnand %p2462_p8, %p2456_p5 }
  0x18   :  { %2466 = shalt.err (!%p2463_p9)
}
  0x19   :  { %s2539_s7 = smov 128   ;;  %s2540_s8 = smov 8  }
  0x1a   :  { %27 = dma.hbm_to_vmem [thread:$0]  %s3492_s0, 1024, %s22_s29, [#allocation5], %s2539_s7, %s2539_s7, %s2540_s8  }
  0x1b   :  { %s2541_s1 = smov [#allocation9]  }
  0x1c   :  { %s45_s11 = sshll.u32 %s2541_s1, 4  ;;  %s46_s11 = int_to_ptr.vmem [resolvable:$true] %s45_s11 }
  0x1d   :  { %s2475_s12 = scalar_lea.vmem %s46_s11, 6144  ;;  %p2480_p11 = scmp.lt.s32.totalorder %s46_s11, %s46_s11 }
  0x1e   :  { %p2476_p10 = scmp.ne.s32.totalorder %s46_s11, %s2475_s12  ;;  %p2481_p12 = scmp.lt.s32.totalorder %s2475_s12, %s2475_s12 }
  0x20   :  { %p2482_p13 = por %p2481_p12, %p2480_p11 }
  0x22   :  { %p2483_p0 = pnand %p2482_p13, %p2476_p10 }
  0x24   :  { %2486 = shalt.err (!%p2483_p0)
}
  0x25   :  { %51 = dma.hbm_to_vmem [thread:$0]  %s3494_s2, 6144, %s46_s11, [#allocation8], %s2536_s24, %s2536_s24, %s2537_s25  }
  0x26   :  { %2527 = dma.done.wait [#allocation5], 1024  }
  0x27   :  { %2528 = vsyncadd [#allocation5], 4294966272 }
  0x28   :  { %2529 = dma.done.wait [#allocation8], 7680  }
  0x29   :  { %2530 = vsyncadd [#allocation8], 4294959616  ;;  %v3499_v0 = vmov 0.0   ;;  %v88_v1 = vld [vmem:[#allocation7 + $0x50] sm:$0xff]  ;;  %v87_v2 = vld [vmem:[#allocation7 + $0x48] sm:$0xff]  ;;  %vm107_vm0 = vcmask 261120  }
  0x2a   :  { %196 = vmatprep.mubr.f32.mxu0 %v3499_v0  ;;  %v85_v3 = vld [vmem:[#allocation7 + $0x38] sm:$0xff]  ;;  %156 = vmatprep.subr.mxu0 %v88_v1  ;;  %v84_v4 = vld [vmem:[#allocation7 + $0x30] sm:$0xff]  ;;  %v82_v5 = vld [vmem:[#allocation7 + $0x20] sm:$0xff]  ;;  %vm2543_vm1 = vmmov 0   ;;  %s2545_s19 = smov [#allocation11]  }
  0x2b   :  { %157 = vmatpush1.msra.mxu0 %v87_v2  ;;  %v70_v6 = vld [vmem:[#allocation4] sm:$0xff]  ;;  %v81_v7 = vld [vmem:[#allocation7 + $0x18] sm:$0xff]  ;;  %v79_v8 = vld [vmem:[#allocation7 + $0x8] sm:$0xff]  ;;  %s1792_s20 = sshll.u32 %s2545_s19, 4  ;;  %s1793_s20 = int_to_ptr.vmem [resolvable:$true] %s1792_s20 }
  0x2c   :  { %158 = vmatprep.subr.mxu0 %v85_v3  ;;  %1995 = vmatprep.mubr.msk.f32.mxu1 %vm107_vm0, %v70_v6  ;;  %v78_v9 = vld [vmem:[#allocation7] sm:$0xff]  ;;  %v2595_v10 = vld [vmem:[#allocation9 + $0x170] sm:$0xff]  ;;  %v2597_v11 = vld [vmem:[#allocation9 + $0x168] sm:$0xff] }
  0x2d   :  { %159 = vmatpush1.msra.mxu0 %v84_v4  ;;  %3518 = vst [vmem:[#allocation17_spill] sm:$0xff] %v2595_v10  ;;  %v2599_v12 = vld [vmem:[#allocation9 + $0x158] sm:$0xff]  ;;  %v2603_v13 = vld [vmem:[#allocation9 + $0x150] sm:$0xff]  ;;  %v2607_v14 = vld [vmem:[#allocation4 + $0x8] sm:$0xff] }
  0x2e   :  { %160 = vmatprep.subr.mxu0 %v82_v5  ;;  %v2609_v15 = vld [vmem:[#allocation9 + $0x140] sm:$0xff]  ;;  %v2612_v16 = vld [vmem:[#allocation9 + $0x138] sm:$0xff]  ;;  %v2615_v17 = vld [vmem:[#allocation9 + $0x128] sm:$0xff] }
  0x2f   :  { %161 = vmatpush1.msra.mxu0 %v81_v7  ;;  %v89_v18 = vld [vmem:[#allocation7 + $0x58] sm:$0xff]  ;;  %v2620_v19 = vld [vmem:[#allocation9 + $0x120] sm:$0xff]  ;;  %v2624_v20 = vld [vmem:[#allocation4 + $0x10] sm:$0xff] }
  0x30   :  { %162 = vmatprep.subr.mxu0 %v79_v8  ;;  %v2626_v21 = vld [vmem:[#allocation9 + $0x110] sm:$0xff]  ;;  %v2629_v22 = vld [vmem:[#allocation9 + $0x108] sm:$0xff]  ;;  %1987 = vmatprep.subr.mxu1 %v89_v18  ;;  %v2632_v23 = vld [vmem:[#allocation9 + $0xf8] sm:$0xff] }
  0x31   :  { %163 = vmatpush1.msra.mxu0 %v78_v9  ;;  %1988 = vmatpush3.msra.mxu1 %v89_v18  ;;  %v86_v24 = vld [vmem:[#allocation7 + $0x40] sm:$0xff]  ;;  %v2637_v25 = vld [vmem:[#allocation9 + $0xf0] sm:$0xff]  ;;  %v2641_v26 = vld [vmem:[#allocation4 + $0x18] sm:$0xff] }
  0x32   :  { %1806 = vmatmul.mubr.msk.f32.vlgmr.msra.gmra.mxu0 %vm107_vm0, %v70_v6  ;;  %427 = vmatprep.subr.mxu0 %v2595_v10  ;;  %v2643_v27 = vld [vmem:[#allocation9 + $0xe0] sm:$0xff]  ;;  %v2646_v28 = vld [vmem:[#allocation9 + $0xd8] sm:$0xff]  ;;  %v2649_v29 = vld [vmem:[#allocation9 + $0xc8] sm:$0xff]  ;;  %v92_v6 = vlaneseq }
  0x33   :  { %428 = vmatpush1.msra.mxu0 %v2597_v11  ;;  %202 = vmatprep.mubr.f32.mxu0 %v3499_v0  ;;  %v83_v30 = vld [vmem:[#allocation7 + $0x28] sm:$0xff]  ;;  %v2654_v31 = vld [vmem:[#allocation9 + $0xc0] sm:$0xff]  ;;  %v2660_v33 = vld [vmem:[#allocation9 + $0xb0] sm:$0xff] }
  0x34   :  { %429 = vmatprep.subr.mxu0 %v2599_v12  ;;  %1989 = vmatprep.subr.mxu1 %v86_v24  ;;  %v2658_v32 = vld [vmem:[#allocation4 + $0x20] sm:$0xff]  ;;  %v2663_v34 = vld [vmem:[#allocation9 + $0xa8] sm:$0xff]  ;;  %v2666_v35 = vld [vmem:[#allocation9 + $0x98] sm:$0xff]  ;;  %v93_v7 = vshrl.u32 %v92_v6, 7 }
  0x35   :  { %430 = vmatpush1.msra.mxu0 %v2603_v13  ;;  %1990 = vmatpush3.msra.mxu1 %v86_v24  ;;  %v80_v36 = vld [vmem:[#allocation7 + $0x10] sm:$0xff]  ;;  %v2675_v38 = vld [vmem:[#allocation4 + $0x28] sm:$0xff]  ;;  %v2677_v39 = vld [vmem:[#allocation9 + $0x80] sm:$0xff] }
  0x36   :  { %1807 = vmatmul.mubr.msk.f32.gmra.mxu0 %vm107_vm0, %v2607_v14  ;;  %431 = vmatprep.subr.mxu0 %v2609_v15  ;;  %v2671_v37 = vld [vmem:[#allocation9 + $0x90] sm:$0xff]  ;;  %v2680_v40 = vld [vmem:[#allocation9 + $0x78] sm:$0xff]  ;;  %v2683_v41 = vld [vmem:[#allocation9 + $0x68] sm:$0xff]  ;;  %v94_v8 = vsub.s32 0, %v93_v7  ;;  %v98_v18 = vsub.s32 1, %v93_v7 }
  0x37   :  { %432 = vmatpush1.msra.mxu0 %v2612_v16  ;;  %208 = vmatprep.mubr.f32.mxu0 %v3499_v0  ;;  %v2688_v42 = vld [vmem:[#allocation9 + $0x60] sm:$0xff]  ;;  %v76_v43 = vld [vmem:[#allocation4 + $0x30] sm:$0xff]  ;;  %v2695_v45 = vld [vmem:[#allocation9 + $0x48] sm:$0xff] }
  0x38   :  { %433 = vmatprep.subr.mxu0 %v2615_v17  ;;  %1991 = vmatprep.subr.mxu1 %v83_v30  ;;  %v2692_v44 = vld [vmem:[#allocation9 + $0x50] sm:$0xff]  ;;  %v2699_v46 = vld [vmem:[#allocation9 + $0x38] sm:$0xff]  ;;  %v2711_v50 = vld [vmem:[#allocation9 + $0x20] sm:$0xff] }
  0x39   :  { %434 = vmatpush1.msra.mxu0 %v2620_v19  ;;  %1992 = vmatpush3.msra.mxu1 %v83_v30  ;;  %v2703_v47 = vld [vmem:[#allocation9 + $0x178] sm:$0xff]  ;;  %v2707_v48 = vld [vmem:[#allocation9 + $0x30] sm:$0xff]  ;;  %v2718_v52 = vld [vmem:[#allocation9 + $0x8] sm:$0xff] }
  0x3a   :  { %1808 = vmatmul.mubr.msk.f32.gmra.mxu0 %vm107_vm0, %v2624_v20  ;;  %435 = vmatprep.subr.mxu0 %v2626_v21  ;;  %v77_v49 = vld [vmem:[#allocation4 + $0x38] sm:$0xff]  ;;  %3520 = vst [vmem:[#allocation19_spill] sm:$0xff] %v2718_v52  ;;  %v2721_v53 = vld [vmem:[#allocation9 + $0x160] sm:$0xff]  ;;  %v2729_v55 = vld [vmem:[#allocation9 + $0x148] sm:$0xff] }
  0x3b   :  { %436 = vmatpush1.msra.mxu0 %v2629_v22  ;;  %214 = vmatprep.mubr.f32.mxu0 %v3499_v0  ;;  %v2714_v51 = vld [vmem:[#allocation9 + $0x18] sm:$0xff]  ;;  %v2725_v54 = vld [vmem:[#allocation9] sm:$0xff]  ;;  %v2735_v56 = vld [vmem:[#allocation9 + $0x130] sm:$0xff] }
  0x3c   :  { %437 = vmatprep.subr.mxu0 %v2632_v23  ;;  %1993 = vmatprep.subr.mxu1 %v80_v36  ;;  %3519 = vst [vmem:[#allocation18_spill] sm:$0xff] %v2714_v51  ;;  %3521 = vst [vmem:[#allocation20_spill] sm:$0xff] %v2725_v54  ;;  %v2740_v57 = vld [vmem:[#allocation9 + $0x118] sm:$0xff]  ;;  %v2747_v58 = vld [vmem:[#allocation9 + $0x100] sm:$0xff] }
  0x3d   :  { %438 = vmatpush1.msra.mxu0 %v2637_v25  ;;  %1994 = vmatpush3.msra.mxu1 %v80_v36  ;;  %v2755_v59 = vld [vmem:[#allocation9 + $0xe8] sm:$0xff]  ;;  %v2761_v60 = vld [vmem:[#allocation9 + $0xd0] sm:$0xff]  ;;  %v2768_v61 = vld [vmem:[#allocation9 + $0xb8] sm:$0xff] }
  0x3e   :  { %1809 = vmatmul.mubr.msk.f32.gmra.mxu0 %vm107_vm0, %v2641_v26  ;;  %439 = vmatprep.subr.mxu0 %v2643_v27  ;;  %v2774_v62 = vld [vmem:[#allocation9 + $0xa0] sm:$0xff]  ;;  %v2781_v63 = vld [vmem:[#allocation9 + $0x88] sm:$0xff]  ;;  %v2787_v1 = vld [vmem:[#allocation9 + $0x70] sm:$0xff] }
  0x3f   :  { %440 = vmatpush1.msra.mxu0 %v2646_v28  ;;  %220 = vmatprep.mubr.f32.mxu0 %v3499_v0  ;;  %v2793_v2 = vld [vmem:[#allocation9 + $0x58] sm:$0xff]  ;;  %v2799_v3 = vld [vmem:[#allocation9 + $0x40] sm:$0xff]  ;;  %v2805_v4 = vld [vmem:[#allocation9 + $0x28] sm:$0xff] }
  0x40   :  { %441 = vmatprep.subr.mxu0 %v2649_v29  ;;  %2007 = vmatprep.subr.mxu1 %v3499_v0  ;;  %3522 = vst [vmem:[#allocation21_spill] sm:$0xff] %v2805_v4  ;;  %v2811_v5 = vld [vmem:[#allocation9 + $0x10] sm:$0xff]  ;;  %v90_v9 = vld [vmem:[%s3495_s3] sm:$0x7] }
  0x41   :  { %442 = vmatpush1.msra.mxu0 %v2654_v31  ;;  %1996 = vmatmul.mubr.msk.f32.vlgmr.msra.gmra.mxu1 %vm107_vm0, %v2607_v14  ;;  %3523 = vst [vmem:[#allocation22_spill] sm:$0xff] %v2811_v5  ;;  %v95_v24 = vrot.slane %v90_v9, %v94_v8  ;;  %v99_v30 = vrot.slane %v90_v9, %v98_v18 }
  0x42   :  { %1810 = vmatmul.mubr.msk.f32.gmra.mxu0 %vm107_vm0, %v2658_v32  ;;  %443 = vmatprep.subr.mxu0 %v2660_v33 }
  0x43   :  { %444 = vmatpush1.msra.mxu0 %v2663_v34  ;;  %226 = vmatprep.mubr.f32.mxu0 %v3499_v0 }
  0x44   :  { %445 = vmatprep.subr.mxu0 %v2666_v35  ;;  %2008 = vmatpush3.msra.mxu1 %v2703_v47 }
  0x45   :  { %446 = vmatpush1.msra.mxu0 %v2671_v37  ;;  %2009 = vmatprep.subr.mxu1 %v3499_v0 }
  0x46   :  { %1811 = vmatmul.mubr.msk.f32.gmra.mxu0 %vm107_vm0, %v2675_v38  ;;  %447 = vmatprep.subr.mxu0 %v2677_v39 }
  0x47   :  { %448 = vmatpush1.msra.mxu0 %v2680_v40  ;;  %232 = vmatprep.mubr.f32.mxu0 %v3499_v0 }
  0x48   :  { %449 = vmatprep.subr.mxu0 %v2683_v41  ;;  %2010 = vmatpush3.msra.mxu1 %v2721_v53 }
  0x49   :  { %450 = vmatpush1.msra.mxu0 %v2688_v42  ;;  %2011 = vmatprep.subr.mxu1 %v3499_v0 }
  0x4a   :  { %1812 = vmatmul.mubr.msk.f32.gmra.mxu0 %vm107_vm0, %v76_v43  ;;  %451 = vmatprep.subr.mxu0 %v2692_v44 }
  0x4b   :  { %452 = vmatpush1.msra.mxu0 %v2695_v45  ;;  %238 = vmatprep.mubr.f32.mxu0 %v3499_v0 }
  0x4c   :  { %453 = vmatprep.subr.mxu0 %v2699_v46  ;;  %2012 = vmatpush3.msra.mxu1 %v2729_v55 }
  0x4d   :  { %454 = vmatpush1.msra.mxu0 %v2707_v48  ;;  %2013 = vmatprep.subr.mxu1 %v3499_v0 }
  0x4e   :  { %1813 = vmatmul.mubr.msk.f32.gmra.mxu0 %vm107_vm0, %v77_v49  ;;  %455 = vmatprep.subr.mxu0 %v2711_v50 }
  0x4f   :  { %456 = vmatpush1.msra.mxu0 %v2714_v51  ;;  %491 = vmatprep.mubr.f32.mxu0 %v3499_v0 }
  0x50   :  { %457 = vmatprep.subr.mxu0 %v2718_v52  ;;  %1998 = vmatprep.mubr.msk.f32.mxu1 %vm107_vm0, %v2624_v20 }
  0x51   :  { %458 = vmatpush1.msra.mxu0 %v2725_v54  ;;  %2014 = vmatpush3.msra.mxu1 %v2735_v56 }
  0x52   :  { %492 = vmatmul.mubr.f32.vlgmr.msra.gmra.mxu0 %v3499_v0  ;;  %600 = vmatprep.subr.mxu0 %v2595_v10 }
  0x53   :  { %2015 = vmatprep.subr.mxu1 %v3499_v0  ;;  %1999 = vmatmul.mubr.msk.f32.gmra.mxu1 %vm107_vm0, %v2641_v26 }
  0x54   :  { %2016 = vmatpush3.msra.mxu1 %v2740_v57  ;;  %2001 = vmatprep.mubr.msk.f32.mxu1 %vm107_vm0, %v2658_v32 }
  0x55   :  { %2017 = vmatprep.subr.mxu1 %v3499_v0  ;;  %601 = vmatpush1.msra.mxu0 %v2597_v11 }
  0x56   :  { %2018 = vmatpush3.msra.mxu1 %v2747_v58  ;;  %602 = vmatprep.subr.mxu0 %v2599_v12 }
  0x57   :  { %2019 = vmatprep.subr.mxu1 %v3499_v0  ;;  %2002 = vmatmul.mubr.msk.f32.gmra.mxu1 %vm107_vm0, %v2675_v38 }
  0x58   :  { %2020 = vmatpush3.msra.mxu1 %v2755_v59  ;;  %2004 = vmatprep.mubr.msk.f32.mxu1 %vm107_vm0, %v76_v43 }
  0x59   :  { %2021 = vmatprep.subr.mxu1 %v3499_v0  ;;  %603 = vmatpush1.msra.mxu0 %v2603_v13 }
  0x5a   :  { %2022 = vmatpush3.msra.mxu1 %v2761_v60  ;;  %604 = vmatprep.subr.mxu0 %v2609_v15 }
  0x5b   :  { %2023 = vmatprep.subr.mxu1 %v3499_v0  ;;  %2005 = vmatmul.mubr.msk.f32.gmra.mxu1 %vm107_vm0, %v77_v49 }
  0x5c   :  { %2024 = vmatpush3.msra.mxu1 %v2768_v61  ;;  %2039 = vmatprep.mubr.msk.f32.mxu1 %vm2543_vm1, %v3499_v0 }
  0x5d   :  { %2025 = vmatprep.subr.mxu1 %v3499_v0  ;;  %605 = vmatpush1.msra.mxu0 %v2612_v16 }
  0x5e   :  { %2026 = vmatpush3.msra.mxu1 %v2774_v62  ;;  %606 = vmatprep.subr.mxu0 %v2615_v17 }
  0x5f   :  { %2027 = vmatprep.subr.mxu1 %v3499_v0  ;;  %607 = vmatpush1.msra.mxu0 %v2620_v19 }
  0x60   :  { %2028 = vmatpush3.msra.mxu1 %v2781_v63  ;;  %608 = vmatprep.subr.mxu0 %v2626_v21 }
  0x61   :  { %2029 = vmatprep.subr.mxu1 %v3499_v0  ;;  %609 = vmatpush1.msra.mxu0 %v2629_v22 }
  0x62   :  { %2030 = vmatpush3.msra.mxu1 %v2787_v1  ;;  %610 = vmatprep.subr.mxu0 %v2632_v23 }
  0x63   :  { %2031 = vmatprep.subr.mxu1 %v3499_v0  ;;  %611 = vmatpush1.msra.mxu0 %v2637_v25 }
  0x64   :  { %2032 = vmatpush3.msra.mxu1 %v2793_v2  ;;  %612 = vmatprep.subr.mxu0 %v2643_v27 }
  0x65   :  { %2033 = vmatprep.subr.mxu1 %v3499_v0  ;;  %613 = vmatpush1.msra.mxu0 %v2646_v28 }
  0x66   :  { %2034 = vmatpush3.msra.mxu1 %v2799_v3  ;;  %614 = vmatprep.subr.mxu0 %v2649_v29 }
  0x67   :  { %2035 = vmatprep.subr.mxu1 %v3499_v0  ;;  %615 = vmatpush1.msra.mxu0 %v2654_v31 }
  0x68   :  { %2036 = vmatpush3.msra.mxu1 %v2805_v4  ;;  %616 = vmatprep.subr.mxu0 %v2660_v33 }
  0x69   :  { %2037 = vmatprep.subr.mxu1 %v3499_v0  ;;  %617 = vmatpush1.msra.mxu0 %v2663_v34 }
  0x6a   :  { %2038 = vmatpush3.msra.mxu1 %v2811_v5  ;;  %618 = vmatprep.subr.mxu0 %v2666_v35 }
  0x6b   :  { %2040 = vmatmul.mubr.f32.vlgmr.msra.gmra.mxu1 %v3499_v0  ;;  %2042 = vmatprep.subr.mxu1 %v3499_v0 }
  0x6c   :  { %2043 = vmatpush3.msra.mxu1 %v2703_v47  ;;  %619 = vmatpush1.msra.mxu0 %v2671_v37 }
  0x6d   :  { %2044 = vmatprep.subr.mxu1 %v3499_v0  ;;  %620 = vmatprep.subr.mxu0 %v2677_v39 }
  0x6e   :  { %2045 = vmatpush3.msra.mxu1 %v2721_v53  ;;  %621 = vmatpush1.msra.mxu0 %v2680_v40 }
  0x6f   :  { %2046 = vmatprep.subr.mxu1 %v3499_v0  ;;  %622 = vmatprep.subr.mxu0 %v2683_v41 }
  0x70   :  { %2047 = vmatpush3.msra.mxu1 %v2729_v55  ;;  %623 = vmatpush1.msra.mxu0 %v2688_v42 }
  0x71   :  { %2048 = vmatprep.subr.mxu1 %v3499_v0  ;;  %624 = vmatprep.subr.mxu0 %v2692_v44 }
  0x72   :  { %2049 = vmatpush3.msra.mxu1 %v2735_v56  ;;  %625 = vmatpush1.msra.mxu0 %v2695_v45 }
  0x73   :  { %2050 = vmatprep.subr.mxu1 %v3499_v0  ;;  %626 = vmatprep.subr.mxu0 %v2699_v46 }
  0x74   :  { %2051 = vmatpush3.msra.mxu1 %v2740_v57  ;;  %627 = vmatpush1.msra.mxu0 %v2707_v48 }
  0x75   :  { %2052 = vmatprep.subr.mxu1 %v3499_v0  ;;  %628 = vmatprep.subr.mxu0 %v2711_v50 }
  0x76   :  { %2053 = vmatpush3.msra.mxu1 %v2747_v58  ;;  %629 = vmatpush1.msra.mxu0 %v2714_v51 }
  0x77   :  { %2054 = vmatprep.subr.mxu1 %v3499_v0  ;;  %630 = vmatprep.subr.mxu0 %v2718_v52 }
  0x78   :  { %2055 = vmatpush3.msra.mxu1 %v2755_v59  ;;  %631 = vmatpush1.msra.mxu0 %v2725_v54 }
  0x79   :  { %2056 = vmatprep.subr.mxu1 %v3499_v0  ;;  %664 = vmatprep.mubr.f32.mxu0 %v3499_v0 }
  0x7a   :  { %2057 = vmatpush3.msra.mxu1 %v2761_v60  ;;  %2074 = vmatprep.mubr.msk.f32.mxu1 %vm2543_vm1, %v3499_v0 }
  0x7b   :  { %2058 = vmatprep.subr.mxu1 %v3499_v0  ;;  %768 = vmatprep.subr.mxu0 %v2595_v10 }
  0x7c   :  { %2059 = vmatpush3.msra.mxu1 %v2768_v61 }
  0x7d   :  { %2060 = vmatprep.subr.mxu1 %v3499_v0 }
  0x7e   :  { %2061 = vmatpush3.msra.mxu1 %v2774_v62 }
  0x7f   :  { %2062 = vmatprep.subr.mxu1 %v3499_v0 }
  0x80   :  { %2063 = vmatpush3.msra.mxu1 %v2781_v63 }
  0x81   :  { %2064 = vmatprep.subr.mxu1 %v3499_v0 }
  0x82   :  { %2065 = vmatpush3.msra.mxu1 %v2787_v1 }
  0x83   :  { %2066 = vmatprep.subr.mxu1 %v3499_v0 }
  0x84   :  { %2067 = vmatpush3.msra.mxu1 %v2793_v2 }
  0x85   :  { %2068 = vmatprep.subr.mxu1 %v3499_v0 }
  0x86   :  { %2069 = vmatpush3.msra.mxu1 %v2799_v3 }
  0x87   :  { %2070 = vmatprep.subr.mxu1 %v3499_v0 }
  0x88   :  { %2071 = vmatpush3.msra.mxu1 %v2805_v4  ;;  %v102_v4 = vsub.s32 2, %v93_v7 }
  0x89   :  { %2072 = vmatprep.subr.mxu1 %v3499_v0 }
  0x8a   :  { %2073 = vmatpush3.msra.mxu1 %v2811_v5 }
  0x8b   :  { %2077 = vmatprep.subr.mxu1 %v3499_v0 }
  0xf2   :  { %v198_v14 = vpop.f32.mrf.mxu0 }
  0xf4   :  { %v200_v20 = vpop.f32.mrf.mxu0 }
  0xf6   :  { %v204_v26 = vpop.f32.mrf.mxu0 }
  0xf7   :  { %v2874_v32 = vadd.f32 %v204_v26, %v95_v24 }
  0xf8   :  { %v206_v36 = vpop.f32.mrf.mxu0 }
  0xf9   :  { %3524 = vst [vmem:[#allocation23_spill] sm:$0xff] %v2874_v32  ;;  %v2876_v38 = vadd.f32 %v206_v36, %v99_v30 }
  0xfa   :  { %v210_v43 = vpop.f32.mrf.mxu0 }
  0xfb   :  { %3525 = vst [vmem:[#allocation24_spill] sm:$0xff] %v2876_v38  ;;  %v2878_v49 = vadd.f32 %v210_v43, %v95_v24  ;;  %v103_v38 = vrot.slane %v90_v9, %v102_v4 }
  0xfc   :  { %v212_v6 = vpop.f32.mrf.mxu0 }
  0xfd   :  { %3526 = vst [vmem:[#allocation25_spill] sm:$0xff] %v2878_v49  ;;  %v2880_v0 = vadd.f32 %v212_v6, %v99_v30 }
  0xfe   :  { %v216_v10 = vpop.f32.mrf.mxu0 }
  0xff   :  { %3527 = vst [vmem:[#allocation26_spill] sm:$0xff] %v2880_v0  ;;  %v2882_v5 = vadd.f32 %v216_v10, %v95_v24 }
 0x100   :  { %v218_v54 = vpop.f32.mrf.mxu0 }
 0x101   :  { %3528 = vst [vmem:[#allocation27_spill] sm:$0xff] %v2882_v5  ;;  %v2884_v52 = vadd.f32 %v218_v54, %v99_v30  ;;  %v1997_v0 = vpop.f32.mrf.mxu1 }
 0x102   :  { %v222_v8 = vpop.f32.mrf.mxu0  ;;  %v2894_v5 = vadd.f32 %v1997_v0, %v103_v38 }
 0x103   :  { %3529 = vst [vmem:[#allocation28_spill] sm:$0xff] %v2884_v52  ;;  %v2886_v18 = vadd.f32 %v222_v8, %v95_v24 }
 0x104   :  { %v224_v26 = vpop.f32.mrf.mxu0 }
 0x105   :  { %3530 = vst [vmem:[#allocation29_spill] sm:$0xff] %v2886_v18  ;;  %v2888_v32 = vadd.f32 %v224_v26, %v99_v30 }
 0x106   :  { %v228_v36 = vpop.f32.mrf.mxu0 }
 0x107   :  { %3531 = vst [vmem:[#allocation30_spill] sm:$0xff] %v2888_v32  ;;  %v2890_v43 = vadd.f32 %v228_v36, %v95_v24  ;;  %v199_v32 = vadd.f32 %v198_v14, %v95_v24 }
 0x108   :  { %v230_v49 = vpop.f32.mrf.mxu0 }
 0x109   :  { %3532 = vst [vmem:[#allocation31_spill] sm:$0xff] %v2890_v43  ;;  %v2892_v6 = vadd.f32 %v230_v49, %v99_v30  ;;  %v311_v49 = vpop.f32.mrf.mxu1 }
 0x10a   :  { %v234_v10 = vpop.f32.mrf.mxu0 }
 0x10b   :  { %3533 = vst [vmem:[#allocation32_spill] sm:$0xff] %v2892_v6  ;;  %v2896_v54 = vadd.f32 %v234_v10, %v95_v24 }
 0x10c   :  { %v236_v52 = vpop.f32.mrf.mxu0 }
 0x10d   :  { %3534 = vst [vmem:[#allocation33_spill] sm:$0xff] %v2896_v54  ;;  %v2898_v7 = vadd.f32 %v236_v52, %v99_v30  ;;  %v201_v54 = vadd.f32 %v200_v20, %v99_v30 }
 0x10e   :  { %v240_v8 = vpop.f32.mrf.mxu0 }
 0x10f   :  { %3535 = vst [vmem:[#allocation34_spill] sm:$0xff] %v2898_v7  ;;  %v2900_v18 = vadd.f32 %v240_v8, %v95_v24 }
 0x110   :  { %v242_v26 = vpop.f32.mrf.mxu0 }
 0x111   :  { %3536 = vst [vmem:[#allocation35_spill] sm:$0xff] %v2900_v18  ;;  %v2902_v4 = vadd.f32 %v242_v26, %v99_v30 }
 0x112   :  { %v493_v9 = vpop.f32.mrf.mxu0 }
 0x113   :  { %3537 = vst [vmem:[#allocation36_spill] sm:$0xff] %v2902_v4  ;;  %v568_v36 = vadd.f32 %v493_v9, %v199_v32  ;;  %v2000_v43 = vpop.f32.mrf.mxu1 }
 0x114   :  { %v2904_v51 = vadd.f32 %v2000_v43, %v103_v38  ;;  %v495_v8 = vpop.f32.mrf.mxu0 }
 0x115   :  { %v1822_v6 = vmul.f32 -1.442695, %v568_v36  ;;  %v321_v0 = vpop.f32.mrf.mxu1  ;;  %v569_v26 = vadd.f32 %v495_v8, %v201_v54  ;;  %v312_v8 = vadd.f32 %v311_v49, %v103_v38  ;;  %v3545_v49 = vld [vmem:[#allocation18_spill] sm:$0xff] }
 0x116   :  { %3538 = vst [vmem:[#allocation37_spill] sm:$0xff] %v2904_v51  ;;  %v2906_v10 = vadd.f32 %v321_v0, %v103_v38 }
 0x117   :  { %2298 = vpow2.f32 %v1822_v6  ;;  %v2003_v52 = vpop.f32.mrf.mxu1  ;;  %v1823_v43 = vmul.f32 -1.442695, %v569_v26 }
 0x118   :  { %3539 = vst [vmem:[#allocation38_spill] sm:$0xff] %v2906_v10  ;;  %v2908_v7 = vadd.f32 %v2003_v52, %v103_v38  ;;  %v2919_v52 = vld [vmem:[%s3496_s4] ss:$0 sm:$0xff] }
 0x119   :  { %v331_v18 = vpop.f32.mrf.mxu1  ;;  %2300 = vpow2.f32 %v1823_v43 }
 0x11a   :  { %3540 = vst [vmem:[#allocation39_spill] sm:$0xff] %v2908_v7  ;;  %v2910_v14 = vadd.f32 %v331_v18, %v103_v38 }
 0x11b   :  { %v2006_v24 = vpop.f32.mrf.mxu1 }
 0x11c   :  { %3541 = vst [vmem:[#allocation40_spill] sm:$0xff] %v2910_v14  ;;  %v2912_v32 = vadd.f32 %v2006_v24, %v103_v38 }
 0x11d   :  { %v341_v9 = vpop.f32.mrf.mxu1 }
 0x11e   :  { %3542 = vst [vmem:[#allocation41_spill] sm:$0xff] %v2912_v32  ;;  %v2914_v36 = vadd.f32 %v341_v9, %v103_v38  ;;  %v3544_v38 = vmov 0.0  }
 0x120   :  { %3543 = vst [vmem:[#allocation42_spill] sm:$0xff] %v2914_v36 }
 0x124   :  { %v2299_v6 = vpop.eup %2298 }
 0x125   :  { %v573_v4 = vadd.f32 1.0, %v2299_v6 }
 0x126   :  { %v2301_v18 = vpop.eup %2300 }
 0x127   :  { %2302 = vrcp.f32 %v573_v4  ;;  %v579_v9 = vadd.f32 1.0, %v2301_v18  ;;  %v3550_v18 = vld [vmem:[#allocation17_spill] sm:$0xff] }
 0x12b   :  { %v564_v0 = vpop.f32.mrf.mxu1 }
 0x12c   :  { %v588_v30 = vadd.f32 %v2919_v52, %v564_v0  ;;  %v3547_v0 = vld [vmem:[#allocation19_spill] sm:$0xff] }
 0x12d   :  { %v2041_v20 = vpop.f32.mrf.mxu1 }
 0x12e   :  { %v3548_v20 = vld [vmem:[#allocation20_spill] sm:$0xff] }
 0x134   :  { %v2303_v54 = vpop.eup %2302 }
 0x135   :  { %v589_v24 = vmul.f32 %v2303_v54, %v588_v30  ;;  %v3549_v30 = vld [vmem:[#allocation22_spill] sm:$0xff] }
 0x137   :  { %v590_v32 = vadd.f32 %v589_v24, %v312_v8  ;;  %v3551_v24 = vld [vmem:[#allocation23_spill] sm:$0xff] }
 0x139   :  { %2304 = vtanh.f32 %v590_v32  ;;  %v3546_v32 = vld [vmem:[#allocation21_spill] sm:$0xff] }
 0x13a   :  { %2306 = vrcp.f32 %v579_v9 }
 0x146   :  { %v2305_v26 = vpop.eup %2304 }
 0x147   :  { %v592_v43 = vsub.f32 0.0, %v2305_v26  ;;  %v2307_v4 = vpop.eup %2306 }
 0x149   :  { %v593_v6 = vmul.f32 %v2307_v4, %v592_v43 }
 0x14b   :  { %v2922_v36 = vadd.f32 %v2305_v26, %v593_v6  ;;  %v3552_v6 = vld [vmem:[#allocation24_spill] sm:$0xff] }
 0x14d   :  { %595 = vst [vmem:[#allocation10] sm:$0xff] %v2922_v36  ;;  %665 = vmatmul.mubr.f32.vlgmr.msra.gmra.mxu0 %v2922_v36  ;;  %2075 = vmatmul.mubr.f32.vlgmr.msra.gmra.mxu1 %v2922_v36 }
 0x14e   :  { %769 = vmatpush1.msra.mxu0 %v2597_v11  ;;  %2078 = vmatpush3.msra.mxu1 %v2703_v47 }
 0x14f   :  { %770 = vmatprep.subr.mxu0 %v2599_v12  ;;  %2079 = vmatprep.subr.mxu1 %v3544_v38 }
 0x150   :  { %771 = vmatpush1.msra.mxu0 %v2603_v13  ;;  %2080 = vmatpush3.msra.mxu1 %v2721_v53 }
 0x151   :  { %772 = vmatprep.subr.mxu0 %v2609_v15  ;;  %2081 = vmatprep.subr.mxu1 %v3544_v38 }
 0x152   :  { %773 = vmatpush1.msra.mxu0 %v2612_v16  ;;  %2082 = vmatpush3.msra.mxu1 %v2729_v55 }
 0x153   :  { %774 = vmatprep.subr.mxu0 %v2615_v17  ;;  %2083 = vmatprep.subr.mxu1 %v3544_v38 }
 0x154   :  { %775 = vmatpush1.msra.mxu0 %v2620_v19  ;;  %2084 = vmatpush3.msra.mxu1 %v2735_v56 }
 0x155   :  { %776 = vmatprep.subr.mxu0 %v2626_v21  ;;  %2085 = vmatprep.subr.mxu1 %v3544_v38 }
 0x156   :  { %777 = vmatpush1.msra.mxu0 %v2629_v22  ;;  %2086 = vmatpush3.msra.mxu1 %v2740_v57 }
 0x157   :  { %778 = vmatprep.subr.mxu0 %v2632_v23  ;;  %2087 = vmatprep.subr.mxu1 %v3544_v38 }
 0x158   :  { %779 = vmatpush1.msra.mxu0 %v2637_v25  ;;  %2088 = vmatpush3.msra.mxu1 %v2747_v58 }
 0x159   :  { %780 = vmatprep.subr.mxu0 %v2643_v27  ;;  %2089 = vmatprep.subr.mxu1 %v3544_v38 }
 0x15a   :  { %781 = vmatpush1.msra.mxu0 %v2646_v28  ;;  %2090 = vmatpush3.msra.mxu1 %v2755_v59 }
 0x15b   :  { %782 = vmatprep.subr.mxu0 %v2649_v29  ;;  %2091 = vmatprep.subr.mxu1 %v3544_v38 }
 0x15c   :  { %783 = vmatpush1.msra.mxu0 %v2654_v31  ;;  %2092 = vmatpush3.msra.mxu1 %v2761_v60 }
 0x15d   :  { %784 = vmatprep.subr.mxu0 %v2660_v33  ;;  %2093 = vmatprep.subr.mxu1 %v3544_v38 }
 0x15e   :  { %785 = vmatpush1.msra.mxu0 %v2663_v34  ;;  %2094 = vmatpush3.msra.mxu1 %v2768_v61 }
 0x15f   :  { %786 = vmatprep.subr.mxu0 %v2666_v35  ;;  %2095 = vmatprep.subr.mxu1 %v3544_v38 }
 0x160   :  { %787 = vmatpush1.msra.mxu0 %v2671_v37  ;;  %2096 = vmatpush3.msra.mxu1 %v2774_v62 }
 0x161   :  { %788 = vmatprep.subr.mxu0 %v2677_v39  ;;  %2097 = vmatprep.subr.mxu1 %v3544_v38 }
 0x162   :  { %789 = vmatpush1.msra.mxu0 %v2680_v40  ;;  %2098 = vmatpush3.msra.mxu1 %v2781_v63 }
 0x163   :  { %790 = vmatprep.subr.mxu0 %v2683_v41  ;;  %2099 = vmatprep.subr.mxu1 %v3544_v38 }
 0x164   :  { %791 = vmatpush1.msra.mxu0 %v2688_v42  ;;  %2100 = vmatpush3.msra.mxu1 %v2787_v1 }
 0x165   :  { %792 = vmatprep.subr.mxu0 %v2692_v44  ;;  %2101 = vmatprep.subr.mxu1 %v3544_v38 }
 0x166   :  { %793 = vmatpush1.msra.mxu0 %v2695_v45  ;;  %2102 = vmatpush3.msra.mxu1 %v2793_v2 }
 0x167   :  { %794 = vmatprep.subr.mxu0 %v2699_v46  ;;  %2103 = vmatprep.subr.mxu1 %v3544_v38 }
 0x168   :  { %795 = vmatpush1.msra.mxu0 %v2707_v48  ;;  %2104 = vmatpush3.msra.mxu1 %v2799_v3 }
 0x169   :  { %796 = vmatprep.subr.mxu0 %v2711_v50  ;;  %2105 = vmatprep.subr.mxu1 %v3544_v38 }
 0x16a   :  { %797 = vmatpush1.msra.mxu0 %v3545_v49  ;;  %2106 = vmatpush3.msra.mxu1 %v3546_v32 }
 0x16b   :  { %798 = vmatprep.subr.mxu0 %v3547_v0  ;;  %2107 = vmatprep.subr.mxu1 %v3544_v38 }
 0x16c   :  { %799 = vmatpush1.msra.mxu0 %v3548_v20  ;;  %832 = vmatprep.mubr.f32.mxu0 %v3544_v38 }
 0x16d   :  { %2108 = vmatpush3.msra.mxu1 %v3549_v30  ;;  %2109 = vmatprep.mubr.msk.f32.mxu1 %vm2543_vm1, %v3544_v38 }
 0x16e   :  { %936 = vmatprep.subr.mxu0 %v3550_v18  ;;  %2112 = vmatprep.subr.mxu1 %v3544_v38 }
 0x20d   :  { %v666_v54 = vpop.f32.mrf.mxu0  ;;  %v737_v8 = vpop.f32.mrf.mxu1 }
 0x20e   :  { %v741_v9 = vadd.f32 %v666_v54, %v3551_v24  ;;  %v755_v18 = vadd.f32 %v2919_v52, %v737_v8 }
 0x20f   :  { %v2076_v26 = vpop.f32.mrf.mxu1  ;;  %v668_v4 = vpop.f32.mrf.mxu0 }
 0x210   :  { %v1825_v43 = vmul.f32 -1.442695, %v741_v9  ;;  %v742_v7 = vadd.f32 %v668_v4, %v3552_v6  ;;  %v3560_v4 = vld [vmem:[#allocation26_spill] sm:$0xff] }
 0x212   :  { %2308 = vpow2.f32 %v1825_v43  ;;  %v1826_v14 = vmul.f32 -1.442695, %v742_v7 }
 0x214   :  { %2310 = vpow2.f32 %v1826_v14  ;;  %v3556_v14 = vld [vmem:[#allocation20_spill] sm:$0xff] }
 0x21f   :  { %v2309_v51 = vpop.eup %2308 }
 0x220   :  { %v746_v10 = vadd.f32 1.0, %v2309_v51  ;;  %v3553_v51 = vld [vmem:[#allocation18_spill] sm:$0xff] }
 0x221   :  { %v2311_v30 = vpop.eup %2310 }
 0x222   :  { %2312 = vrcp.f32 %v746_v10  ;;  %v752_v49 = vadd.f32 1.0, %v2311_v30  ;;  %v3555_v10 = vld [vmem:[#allocation19_spill] sm:$0xff] }
 0x22f   :  { %v2313_v20 = vpop.eup %2312 }
 0x230   :  { %v756_v0 = vmul.f32 %v2313_v20, %v755_v18  ;;  %v3559_v20 = vld [vmem:[#allocation25_spill] sm:$0xff] }
 0x232   :  { %v757_v32 = vadd.f32 %v756_v0, %v2894_v5  ;;  %v3554_v5 = vld [vmem:[#allocation21_spill] sm:$0xff] }
 0x234   :  { %2314 = vtanh.f32 %v757_v32 }
 0x235   :  { %2316 = vrcp.f32 %v752_v49  ;;  %v3558_v49 = vld [vmem:[#allocation17_spill] sm:$0xff] }
 0x241   :  { %v2315_v54 = vpop.eup %2314 }
 0x242   :  { %v759_v24 = vsub.f32 %v2922_v36, %v2315_v54  ;;  %v2317_v9 = vpop.eup %2316  ;;  %v3557_v36 = vld [vmem:[#allocation22_spill] sm:$0xff] }
 0x244   :  { %v760_v26 = vmul.f32 %v2317_v9, %v759_v24 }
 0x246   :  { %v2999_v7 = vadd.f32 %v2315_v54, %v760_v26 }
 0x248   :  { %763 = vst [vmem:[#allocation10 + $0x8] sm:$0xff] %v2999_v7  ;;  %833 = vmatmul.mubr.f32.vlgmr.msra.gmra.mxu0 %v2999_v7  ;;  %2110 = vmatmul.mubr.f32.vlgmr.msra.gmra.mxu1 %v2999_v7 }
 0x249   :  { %937 = vmatpush1.msra.mxu0 %v2597_v11  ;;  %2113 = vmatpush3.msra.mxu1 %v2703_v47 }
 0x24a   :  { %938 = vmatprep.subr.mxu0 %v2599_v12  ;;  %2114 = vmatprep.subr.mxu1 %v3544_v38 }
 0x24b   :  { %939 = vmatpush1.msra.mxu0 %v2603_v13  ;;  %2115 = vmatpush3.msra.mxu1 %v2721_v53 }
 0x24c   :  { %940 = vmatprep.subr.mxu0 %v2609_v15  ;;  %2116 = vmatprep.subr.mxu1 %v3544_v38 }
 0x24d   :  { %941 = vmatpush1.msra.mxu0 %v2612_v16  ;;  %2117 = vmatpush3.msra.mxu1 %v2729_v55 }
 0x24e   :  { %942 = vmatprep.subr.mxu0 %v2615_v17  ;;  %2118 = vmatprep.subr.mxu1 %v3544_v38 }
 0x24f   :  { %943 = vmatpush1.msra.mxu0 %v2620_v19  ;;  %2119 = vmatpush3.msra.mxu1 %v2735_v56 }
 0x250   :  { %944 = vmatprep.subr.mxu0 %v2626_v21  ;;  %2120 = vmatprep.subr.mxu1 %v3544_v38 }
 0x251   :  { %945 = vmatpush1.msra.mxu0 %v2629_v22  ;;  %2121 = vmatpush3.msra.mxu1 %v2740_v57 }
 0x252   :  { %946 = vmatprep.subr.mxu0 %v2632_v23  ;;  %2122 = vmatprep.subr.mxu1 %v3544_v38 }
 0x253   :  { %947 = vmatpush1.msra.mxu0 %v2637_v25  ;;  %2123 = vmatpush3.msra.mxu1 %v2747_v58 }
 0x254   :  { %948 = vmatprep.subr.mxu0 %v2643_v27  ;;  %2124 = vmatprep.subr.mxu1 %v3544_v38 }
 0x255   :  { %949 = vmatpush1.msra.mxu0 %v2646_v28  ;;  %2125 = vmatpush3.msra.mxu1 %v2755_v59 }
 0x256   :  { %950 = vmatprep.subr.mxu0 %v2649_v29  ;;  %2126 = vmatprep.subr.mxu1 %v3544_v38 }
 0x257   :  { %951 = vmatpush1.msra.mxu0 %v2654_v31  ;;  %2127 = vmatpush3.msra.mxu1 %v2761_v60 }
 0x258   :  { %952 = vmatprep.subr.mxu0 %v2660_v33  ;;  %2128 = vmatprep.subr.mxu1 %v3544_v38 }
 0x259   :  { %953 = vmatpush1.msra.mxu0 %v2663_v34  ;;  %2129 = vmatpush3.msra.mxu1 %v2768_v61 }
 0x25a   :  { %954 = vmatprep.subr.mxu0 %v2666_v35  ;;  %2130 = vmatprep.subr.mxu1 %v3544_v38 }
 0x25b   :  { %955 = vmatpush1.msra.mxu0 %v2671_v37  ;;  %2131 = vmatpush3.msra.mxu1 %v2774_v62 }
 0x25c   :  { %956 = vmatprep.subr.mxu0 %v2677_v39  ;;  %2132 = vmatprep.subr.mxu1 %v3544_v38 }
 0x25d   :  { %957 = vmatpush1.msra.mxu0 %v2680_v40  ;;  %2133 = vmatpush3.msra.mxu1 %v2781_v63 }
 0x25e   :  { %958 = vmatprep.subr.mxu0 %v2683_v41  ;;  %2134 = vmatprep.subr.mxu1 %v3544_v38 }
 0x25f   :  { %959 = vmatpush1.msra.mxu0 %v2688_v42  ;;  %2135 = vmatpush3.msra.mxu1 %v2787_v1 }
 0x260   :  { %960 = vmatprep.subr.mxu0 %v2692_v44  ;;  %2136 = vmatprep.subr.mxu1 %v3544_v38 }
 0x261   :  { %961 = vmatpush1.msra.mxu0 %v2695_v45  ;;  %2137 = vmatpush3.msra.mxu1 %v2793_v2 }
 0x262   :  { %962 = vmatprep.subr.mxu0 %v2699_v46  ;;  %2138 = vmatprep.subr.mxu1 %v3544_v38 }
 0x263   :  { %963 = vmatpush1.msra.mxu0 %v2707_v48  ;;  %2139 = vmatpush3.msra.mxu1 %v2799_v3 }
 0x264   :  { %964 = vmatprep.subr.mxu0 %v2711_v50  ;;  %2140 = vmatprep.subr.mxu1 %v3544_v38 }
 0x265   :  { %965 = vmatpush1.msra.mxu0 %v3553_v51  ;;  %2141 = vmatpush3.msra.mxu1 %v3554_v5 }
 0x266   :  { %966 = vmatprep.subr.mxu0 %v3555_v10  ;;  %2142 = vmatprep.subr.mxu1 %v3544_v38  ;;  %v3561_v10 = vld [vmem:[#allocation38_spill] sm:$0xff] }
 0x267   :  { %967 = vmatpush1.msra.mxu0 %v3556_v14  ;;  %1000 = vmatprep.mubr.f32.mxu0 %v3544_v38 }
 0x268   :  { %2143 = vmatpush3.msra.mxu1 %v3557_v36  ;;  %2144 = vmatprep.mubr.msk.f32.mxu1 %vm2543_vm1, %v3544_v38 }
 0x269   :  { %1104 = vmatprep.subr.mxu0 %v3558_v49  ;;  %2147 = vmatprep.subr.mxu1 %v3544_v38 }
 0x308   :  { %v834_v32 = vpop.f32.mrf.mxu0  ;;  %v905_v0 = vpop.f32.mrf.mxu1 }
 0x309   :  { %v909_v30 = vadd.f32 %v834_v32, %v3559_v20  ;;  %v923_v49 = vadd.f32 %v2919_v52, %v905_v0  ;;  %v3178_v0 = vld [vmem:[#allocation9 + $0x138] sm:$0xff] }
 0x30a   :  { %v2111_v18 = vpop.f32.mrf.mxu1  ;;  %v836_v43 = vpop.f32.mrf.mxu0 }
 0x30b   :  { %v1827_v8 = vmul.f32 -1.442695, %v909_v30  ;;  %v910_v6 = vadd.f32 %v836_v43, %v3560_v4  ;;  %v3182_v43 = vld [vmem:[#allocation9 + $0x128] sm:$0xff]  ;;  %v3186_v4 = vld [vmem:[#allocation9 + $0x120] sm:$0xff] }
 0x30d   :  { %2318 = vpow2.f32 %v1827_v8  ;;  %v1828_v54 = vmul.f32 -1.442695, %v910_v6  ;;  %v3194_v6 = vld [vmem:[#allocation9 + $0x108] sm:$0xff] }
 0x30f   :  { %2320 = vpow2.f32 %v1828_v54  ;;  %v3202_v54 = vld [vmem:[#allocation9 + $0xf0] sm:$0xff] }
 0x31a   :  { %v2319_v24 = vpop.eup %2318 }
 0x31b   :  { %v914_v9 = vadd.f32 1.0, %v2319_v24  ;;  %v3210_v24 = vld [vmem:[#allocation9 + $0xd8] sm:$0xff] }
 0x31c   :  { %v2321_v26 = vpop.eup %2320 }
 0x31d   :  { %2322 = vrcp.f32 %v914_v9  ;;  %v920_v51 = vadd.f32 1.0, %v2321_v26  ;;  %v3218_v9 = vld [vmem:[#allocation9 + $0xc0] sm:$0xff]  ;;  %v3226_v26 = vld [vmem:[#allocation9 + $0xa8] sm:$0xff] }
 0x32a   :  { %v2323_v36 = vpop.eup %2322 }
 0x32b   :  { %v924_v14 = vmul.f32 %v2323_v36, %v923_v49  ;;  %v3174_v36 = vld [vmem:[#allocation9 + $0x140] sm:$0xff]  ;;  %v3234_v49 = vld [vmem:[#allocation9 + $0x90] sm:$0xff] }
 0x32d   :  { %v925_v5 = vadd.f32 %v924_v14, %v3561_v10  ;;  %v3166_v10 = vld [vmem:[#allocation9 + $0x158] sm:$0xff]  ;;  %v3170_v14 = vld [vmem:[#allocation9 + $0x150] sm:$0xff] }
 0x32f   :  { %2324 = vtanh.f32 %v925_v5  ;;  %v3163_v5 = vld [vmem:[#allocation9 + $0x178] sm:$0xff] }
 0x330   :  { %2326 = vrcp.f32 %v920_v51  ;;  %v3160_v51 = vld [vmem:[#allocation9 + $0x168] sm:$0xff] }
 0x33c   :  { %v2325_v32 = vpop.eup %2324 }
 0x33d   :  { %v927_v20 = vsub.f32 %v2999_v7, %v2325_v32  ;;  %v2327_v30 = vpop.eup %2326 }
 0x33f   :  { %v928_v18 = vmul.f32 %v2327_v30, %v927_v20  ;;  %v3250_v20 = vld [vmem:[#allocation9 + $0x60] sm:$0xff]  ;;  %v3258_v30 = vld [vmem:[#allocation9 + $0x48] sm:$0xff] }
 0x341   :  { %v3076_v8 = vadd.f32 %v2325_v32, %v928_v18  ;;  %v3242_v32 = vld [vmem:[#allocation9 + $0x78] sm:$0xff]  ;;  %v3266_v18 = vld [vmem:[#allocation9 + $0x30] sm:$0xff] }
 0x343   :  { %931 = vst [vmem:[#allocation10 + $0x10] sm:$0xff] %v3076_v8  ;;  %1001 = vmatmul.mubr.f32.vlgmr.msra.gmra.mxu0 %v3076_v8  ;;  %2145 = vmatmul.mubr.f32.vlgmr.msra.gmra.mxu1 %v3076_v8 }
 0x344   :  { %1105 = vmatpush1.msra.mxu0 %v2597_v11  ;;  %2148 = vmatpush3.msra.mxu1 %v2703_v47  ;;  %v3562_v11 = vld [vmem:[#allocation18_spill] sm:$0xff] }
 0x345   :  { %1106 = vmatprep.subr.mxu0 %v2599_v12  ;;  %2149 = vmatprep.subr.mxu1 %v3544_v38  ;;  %v3563_v12 = vld [vmem:[#allocation21_spill] sm:$0xff] }
 0x346   :  { %1107 = vmatpush1.msra.mxu0 %v2603_v13  ;;  %2150 = vmatpush3.msra.mxu1 %v2721_v53  ;;  %v3564_v13 = vld [vmem:[#allocation19_spill] sm:$0xff] }
 0x347   :  { %1108 = vmatprep.subr.mxu0 %v2609_v15  ;;  %2151 = vmatprep.subr.mxu1 %v3544_v38  ;;  %v3565_v15 = vld [vmem:[#allocation20_spill] sm:$0xff] }
 0x348   :  { %1109 = vmatpush1.msra.mxu0 %v2612_v16  ;;  %2152 = vmatpush3.msra.mxu1 %v2729_v55  ;;  %v3566_v16 = vld [vmem:[#allocation22_spill] sm:$0xff] }
 0x349   :  { %1110 = vmatprep.subr.mxu0 %v2615_v17  ;;  %2153 = vmatprep.subr.mxu1 %v3544_v38  ;;  %v3146_v17 = vld [vmem:[#allocation9 + $0x170] sm:$0xff] }
 0x34a   :  { %1111 = vmatpush1.msra.mxu0 %v2620_v19  ;;  %2154 = vmatpush3.msra.mxu1 %v2735_v56 }
 0x34b   :  { %1112 = vmatprep.subr.mxu0 %v2626_v21  ;;  %2155 = vmatprep.subr.mxu1 %v3544_v38 }
 0x34c   :  { %1113 = vmatpush1.msra.mxu0 %v2629_v22  ;;  %2156 = vmatpush3.msra.mxu1 %v2740_v57  ;;  %v3567_v22 = vld [vmem:[#allocation27_spill] sm:$0xff] }
 0x34d   :  { %1114 = vmatprep.subr.mxu0 %v2632_v23  ;;  %2157 = vmatprep.subr.mxu1 %v3544_v38 }
 0x34e   :  { %1115 = vmatpush1.msra.mxu0 %v2637_v25  ;;  %2158 = vmatpush3.msra.mxu1 %v2747_v58 }
 0x34f   :  { %1116 = vmatprep.subr.mxu0 %v2643_v27  ;;  %2159 = vmatprep.subr.mxu1 %v3544_v38 }
 0x350   :  { %1117 = vmatpush1.msra.mxu0 %v2646_v28  ;;  %2160 = vmatpush3.msra.mxu1 %v2755_v59 }
 0x351   :  { %1118 = vmatprep.subr.mxu0 %v2649_v29  ;;  %2161 = vmatprep.subr.mxu1 %v3544_v38  ;;  %v3568_v29 = vld [vmem:[#allocation28_spill] sm:$0xff] }
 0x352   :  { %1119 = vmatpush1.msra.mxu0 %v2654_v31  ;;  %2162 = vmatpush3.msra.mxu1 %v2761_v60 }
 0x353   :  { %1120 = vmatprep.subr.mxu0 %v2660_v33  ;;  %2163 = vmatprep.subr.mxu1 %v3544_v38 }
 0x354   :  { %1121 = vmatpush1.msra.mxu0 %v2663_v34  ;;  %2164 = vmatpush3.msra.mxu1 %v2768_v61 }
 0x355   :  { %1122 = vmatprep.subr.mxu0 %v2666_v35  ;;  %2165 = vmatprep.subr.mxu1 %v3544_v38 }
 0x356   :  { %1123 = vmatpush1.msra.mxu0 %v2671_v37  ;;  %2166 = vmatpush3.msra.mxu1 %v2774_v62 }
 0x357   :  { %1124 = vmatprep.subr.mxu0 %v2677_v39  ;;  %2167 = vmatprep.subr.mxu1 %v3544_v38 }
 0x358   :  { %1125 = vmatpush1.msra.mxu0 %v2680_v40  ;;  %2168 = vmatpush3.msra.mxu1 %v2781_v63 }
 0x359   :  { %1126 = vmatprep.subr.mxu0 %v2683_v41  ;;  %2169 = vmatprep.subr.mxu1 %v3544_v38 }
 0x35a   :  { %1127 = vmatpush1.msra.mxu0 %v2688_v42  ;;  %2170 = vmatpush3.msra.mxu1 %v2787_v1  ;;  %v3569_v42 = vld [vmem:[#allocation37_spill] sm:$0xff] }
 0x35b   :  { %1128 = vmatprep.subr.mxu0 %v2692_v44  ;;  %2171 = vmatprep.subr.mxu1 %v3544_v38 }
 0x35c   :  { %1129 = vmatpush1.msra.mxu0 %v2695_v45  ;;  %2172 = vmatpush3.msra.mxu1 %v2793_v2 }
 0x35d   :  { %1130 = vmatprep.subr.mxu0 %v2699_v46  ;;  %2173 = vmatprep.subr.mxu1 %v3544_v38 }
 0x35e   :  { %1131 = vmatpush1.msra.mxu0 %v2707_v48  ;;  %2174 = vmatpush3.msra.mxu1 %v2799_v3 }
 0x35f   :  { %1132 = vmatprep.subr.mxu0 %v2711_v50  ;;  %2175 = vmatprep.subr.mxu1 %v3544_v38 }
 0x360   :  { %1133 = vmatpush1.msra.mxu0 %v3562_v11  ;;  %2176 = vmatpush3.msra.mxu1 %v3563_v12  ;;  %v3282_v11 = vld [vmem:[#allocation9] sm:$0xff] }
 0x361   :  { %1134 = vmatprep.subr.mxu0 %v3564_v13  ;;  %2177 = vmatprep.subr.mxu1 %v3544_v38  ;;  %3572 = vst [vmem:[#allocation17_spill] sm:$0xff] %v3282_v11  ;;  %v3573_v13 = vld [vmem:[#allocation29_spill] sm:$0xff] }
 0x362   :  { %1135 = vmatpush1.msra.mxu0 %v3565_v15  ;;  %1168 = vmatprep.mubr.f32.mxu0 %v3544_v38 }
 0x363   :  { %2178 = vmatpush3.msra.mxu1 %v3566_v16  ;;  %2179 = vmatprep.mubr.msk.f32.mxu1 %vm2543_vm1, %v3544_v38 }
 0x364   :  { %1272 = vmatprep.subr.mxu0 %v3146_v17  ;;  %2182 = vmatprep.subr.mxu1 %v3544_v38 }
 0x403   :  { %v1002_v19 = vpop.f32.mrf.mxu0  ;;  %v1073_v21 = vpop.f32.mrf.mxu1 }
 0x404   :  { %v1077_v23 = vadd.f32 %v1002_v19, %v3567_v22  ;;  %v1091_v39 = vadd.f32 %v2919_v52, %v1073_v21 }
 0x405   :  { %v2146_v25 = vpop.f32.mrf.mxu1  ;;  %v1004_v28 = vpop.f32.mrf.mxu0 }
 0x406   :  { %v1829_v27 = vmul.f32 -1.442695, %v1077_v23  ;;  %v1078_v31 = vadd.f32 %v1004_v28, %v3568_v29  ;;  %v3574_v23 = vld [vmem:[#allocation30_spill] sm:$0xff] }
 0x408   :  { %2328 = vpow2.f32 %v1829_v27  ;;  %v1830_v33 = vmul.f32 -1.442695, %v1078_v31 }
 0x40a   :  { %2330 = vpow2.f32 %v1830_v33 }
 0x415   :  { %v2329_v34 = vpop.eup %2328 }
 0x416   :  { %v1082_v35 = vadd.f32 1.0, %v2329_v34 }
 0x417   :  { %v2331_v37 = vpop.eup %2330 }
 0x418   :  { %2332 = vrcp.f32 %v1082_v35  ;;  %v1088_v45 = vadd.f32 1.0, %v2331_v37  ;;  %v3575_v35 = vld [vmem:[#allocation40_spill] sm:$0xff] }
 0x425   :  { %v2333_v40 = vpop.eup %2332 }
 0x426   :  { %v1092_v41 = vmul.f32 %v2333_v40, %v1091_v39 }
 0x428   :  { %v1093_v44 = vadd.f32 %v1092_v41, %v3569_v42 }
 0x42a   :  { %2334 = vtanh.f32 %v1093_v44 }
 0x42b   :  { %2336 = vrcp.f32 %v1088_v45 }
 0x437   :  { %v2335_v46 = vpop.eup %2334 }
 0x438   :  { %v1095_v47 = vsub.f32 %v3076_v8, %v2335_v46  ;;  %v2337_v48 = vpop.eup %2336  ;;  %v3274_v8 = vld [vmem:[#allocation9 + $0x18] sm:$0xff] }
 0x439   :  { %3570 = vst [vmem:[#allocation23_spill] sm:$0xff] %v3274_v8 }
 0x43a   :  { %v1096_v50 = vmul.f32 %v2337_v48, %v1095_v47  ;;  %v3312_v47 = vld [vmem:[#allocation9 + $0x148] sm:$0xff]  ;;  %v3318_v48 = vld [vmem:[#allocation9 + $0x130] sm:$0xff] }
 0x43c   :  { %v3155_v7 = vadd.f32 %v2335_v46, %v1096_v50  ;;  %v3306_v46 = vld [vmem:[#allocation9 + $0x160] sm:$0xff]  ;;  %v3324_v50 = vld [vmem:[#allocation9 + $0x118] sm:$0xff] }
 0x43e   :  { %1099 = vst [vmem:[#allocation10 + $0x18] sm:$0xff] %v3155_v7  ;;  %1169 = vmatmul.mubr.f32.vlgmr.msra.gmra.mxu0 %v3155_v7  ;;  %2180 = vmatmul.mubr.f32.vlgmr.msra.gmra.mxu1 %v3155_v7 }
 0x43f   :  { %1273 = vmatpush1.msra.mxu0 %v3160_v51  ;;  %2183 = vmatpush3.msra.mxu1 %v3163_v5 }
 0x440   :  { %1274 = vmatprep.subr.mxu0 %v3166_v10  ;;  %2184 = vmatprep.subr.mxu1 %v3544_v38 }
 0x441   :  { %1275 = vmatpush1.msra.mxu0 %v3170_v14  ;;  %2185 = vmatpush3.msra.mxu1 %v2721_v53  ;;  %v3190_v53 = vld [vmem:[#allocation9 + $0x110] sm:$0xff] }
 0x442   :  { %1276 = vmatprep.subr.mxu0 %v3174_v36  ;;  %2186 = vmatprep.subr.mxu1 %v3544_v38 }
 0x443   :  { %1277 = vmatpush1.msra.mxu0 %v3178_v0  ;;  %2187 = vmatpush3.msra.mxu1 %v2729_v55  ;;  %v3198_v55 = vld [vmem:[#allocation9 + $0xf8] sm:$0xff] }
 0x444   :  { %1278 = vmatprep.subr.mxu0 %v3182_v43  ;;  %2188 = vmatprep.subr.mxu1 %v3544_v38 }
 0x445   :  { %1279 = vmatpush1.msra.mxu0 %v3186_v4  ;;  %2189 = vmatpush3.msra.mxu1 %v2735_v56  ;;  %v3206_v56 = vld [vmem:[#allocation9 + $0xe0] sm:$0xff] }
 0x446   :  { %1280 = vmatprep.subr.mxu0 %v3190_v53  ;;  %2190 = vmatprep.subr.mxu1 %v3544_v38 }
 0x447   :  { %1281 = vmatpush1.msra.mxu0 %v3194_v6  ;;  %2191 = vmatpush3.msra.mxu1 %v2740_v57  ;;  %v3214_v57 = vld [vmem:[#allocation9 + $0xc8] sm:$0xff] }
 0x448   :  { %1282 = vmatprep.subr.mxu0 %v3198_v55  ;;  %2192 = vmatprep.subr.mxu1 %v3544_v38 }
 0x449   :  { %1283 = vmatpush1.msra.mxu0 %v3202_v54  ;;  %2193 = vmatpush3.msra.mxu1 %v2747_v58  ;;  %v3222_v58 = vld [vmem:[#allocation9 + $0xb0] sm:$0xff] }
 0x44a   :  { %1284 = vmatprep.subr.mxu0 %v3206_v56  ;;  %2194 = vmatprep.subr.mxu1 %v3544_v38 }
 0x44b   :  { %1285 = vmatpush1.msra.mxu0 %v3210_v24  ;;  %2195 = vmatpush3.msra.mxu1 %v2755_v59  ;;  %v3230_v59 = vld [vmem:[#allocation9 + $0x98] sm:$0xff] }
 0x44c   :  { %1286 = vmatprep.subr.mxu0 %v3214_v57  ;;  %2196 = vmatprep.subr.mxu1 %v3544_v38 }
 0x44d   :  { %1287 = vmatpush1.msra.mxu0 %v3218_v9  ;;  %2197 = vmatpush3.msra.mxu1 %v2761_v60  ;;  %v3238_v60 = vld [vmem:[#allocation9 + $0x80] sm:$0xff] }
 0x44e   :  { %1288 = vmatprep.subr.mxu0 %v3222_v58  ;;  %2198 = vmatprep.subr.mxu1 %v3544_v38 }
 0x44f   :  { %1289 = vmatpush1.msra.mxu0 %v3226_v26  ;;  %2199 = vmatpush3.msra.mxu1 %v2768_v61  ;;  %v3246_v61 = vld [vmem:[#allocation9 + $0x68] sm:$0xff] }
 0x450   :  { %1290 = vmatprep.subr.mxu0 %v3230_v59  ;;  %2200 = vmatprep.subr.mxu1 %v3544_v38 }
 0x451   :  { %1291 = vmatpush1.msra.mxu0 %v3234_v49  ;;  %2201 = vmatpush3.msra.mxu1 %v2774_v62  ;;  %v3254_v62 = vld [vmem:[#allocation9 + $0x50] sm:$0xff] }
 0x452   :  { %1292 = vmatprep.subr.mxu0 %v3238_v60  ;;  %2202 = vmatprep.subr.mxu1 %v3544_v38 }
 0x453   :  { %1293 = vmatpush1.msra.mxu0 %v3242_v32  ;;  %2203 = vmatpush3.msra.mxu1 %v2781_v63  ;;  %v3262_v63 = vld [vmem:[#allocation9 + $0x38] sm:$0xff] }
 0x454   :  { %1294 = vmatprep.subr.mxu0 %v3246_v61  ;;  %2204 = vmatprep.subr.mxu1 %v3544_v38 }
 0x455   :  { %1295 = vmatpush1.msra.mxu0 %v3250_v20  ;;  %2205 = vmatpush3.msra.mxu1 %v2787_v1  ;;  %v3270_v1 = vld [vmem:[#allocation9 + $0x20] sm:$0xff] }
 0x456   :  { %1296 = vmatprep.subr.mxu0 %v3254_v62  ;;  %2206 = vmatprep.subr.mxu1 %v3544_v38 }
 0x457   :  { %1297 = vmatpush1.msra.mxu0 %v3258_v30  ;;  %2207 = vmatpush3.msra.mxu1 %v2793_v2  ;;  %v3278_v2 = vld [vmem:[#allocation9 + $0x8] sm:$0xff] }
 0x458   :  { %1298 = vmatprep.subr.mxu0 %v3262_v63  ;;  %2208 = vmatprep.subr.mxu1 %v3544_v38  ;;  %3571 = vst [vmem:[#allocation24_spill] sm:$0xff] %v3278_v2 }
 0x459   :  { %1299 = vmatpush1.msra.mxu0 %v3266_v18  ;;  %2209 = vmatpush3.msra.mxu1 %v2799_v3 }
 0x45a   :  { %1300 = vmatprep.subr.mxu0 %v3270_v1  ;;  %2210 = vmatprep.subr.mxu1 %v3544_v38 }
 0x45b   :  { %1301 = vmatpush1.msra.mxu0 %v3274_v8  ;;  %2211 = vmatpush3.msra.mxu1 %v3563_v12 }
 0x45c   :  { %1302 = vmatprep.subr.mxu0 %v3278_v2  ;;  %2212 = vmatprep.subr.mxu1 %v3544_v38 }
 0x45d   :  { %1303 = vmatpush1.msra.mxu0 %v3282_v11  ;;  %1336 = vmatprep.mubr.f32.mxu0 %v3544_v38 }
 0x45e   :  { %2213 = vmatpush3.msra.mxu1 %v3566_v16  ;;  %2214 = vmatprep.mubr.msk.f32.mxu1 %vm2543_vm1, %v3544_v38 }
 0x45f   :  { %1440 = vmatprep.subr.mxu0 %v3146_v17  ;;  %2217 = vmatprep.subr.mxu1 %v3544_v38 }
 0x4fe   :  { %v1170_v3 = vpop.f32.mrf.mxu0  ;;  %v1241_v12 = vpop.f32.mrf.mxu1 }
 0x4ff   :  { %v1245_v15 = vadd.f32 %v1170_v3, %v3573_v13  ;;  %v1259_v31 = vadd.f32 %v2919_v52, %v1241_v12  ;;  %v3336_v3 = vld [vmem:[#allocation9 + $0xe8] sm:$0xff]  ;;  %v3342_v12 = vld [vmem:[#allocation9 + $0xd0] sm:$0xff]  ;;  %v3348_v13 = vld [vmem:[#allocation9 + $0xb8] sm:$0xff] }
 0x500   :  { %v2181_v19 = vpop.f32.mrf.mxu1  ;;  %v1172_v22 = vpop.f32.mrf.mxu0 }
 0x501   :  { %v1831_v21 = vmul.f32 -1.442695, %v1245_v15  ;;  %v1246_v25 = vadd.f32 %v1172_v22, %v3574_v23  ;;  %v3354_v15 = vld [vmem:[#allocation9 + $0xa0] sm:$0xff]  ;;  %v3360_v19 = vld [vmem:[#allocation9 + $0x88] sm:$0xff]  ;;  %v3372_v22 = vld [vmem:[#allocation9 + $0x58] sm:$0xff] }
 0x502   :  { %v3378_v23 = vld [vmem:[#allocation9 + $0x40] sm:$0xff] }
 0x503   :  { %2338 = vpow2.f32 %v1831_v21  ;;  %v1832_v27 = vmul.f32 -1.442695, %v1246_v25  ;;  %v3366_v21 = vld [vmem:[#allocation9 + $0x70] sm:$0xff]  ;;  %v3384_v25 = vld [vmem:[#allocation9 + $0x28] sm:$0xff] }
 0x504   :  { %3576 = vst [vmem:[#allocation25_spill] sm:$0xff] %v3384_v25 }
 0x505   :  { %2340 = vpow2.f32 %v1832_v27  ;;  %v3391_v27 = vld [vmem:[#allocation9 + $0x10] sm:$0xff] }
 0x506   :  { %3577 = vst [vmem:[#allocation26_spill] sm:$0xff] %v3391_v27 }
 0x510   :  { %v2339_v28 = vpop.eup %2338 }
 0x511   :  { %v1250_v16 = vadd.f32 1.0, %v2339_v28 }
 0x512   :  { %v2341_v29 = vpop.eup %2340 }
 0x513   :  { %2342 = vrcp.f32 %v1250_v16  ;;  %v1256_v39 = vadd.f32 1.0, %v2341_v29  ;;  %v3578_v29 = vld [vmem:[#allocation31_spill] sm:$0xff] }
 0x520   :  { %v2343_v33 = vpop.eup %2342 }
 0x521   :  { %v1260_v34 = vmul.f32 %v2343_v33, %v1259_v31 }
 0x523   :  { %v1261_v37 = vadd.f32 %v1260_v34, %v3575_v35 }
 0x525   :  { %2344 = vtanh.f32 %v1261_v37  ;;  %v3579_v37 = vld [vmem:[#allocation32_spill] sm:$0xff] }
 0x526   :  { %2346 = vrcp.f32 %v1256_v39 }
 0x532   :  { %v2345_v40 = vpop.eup %2344 }
 0x533   :  { %v1263_v41 = vsub.f32 %v3155_v7, %v2345_v40  ;;  %v2347_v42 = vpop.eup %2346  ;;  %v3330_v7 = vld [vmem:[#allocation9 + $0x100] sm:$0xff] }
 0x535   :  { %v1264_v44 = vmul.f32 %v2347_v42, %v1263_v41 }
 0x537   :  { %v3296_v45 = vadd.f32 %v2345_v40, %v1264_v44 }
 0x539   :  { %1267 = vst [vmem:[#allocation10 + $0x20] sm:$0xff] %v3296_v45  ;;  %1337 = vmatmul.mubr.f32.vlgmr.msra.gmra.mxu0 %v3296_v45  ;;  %2215 = vmatmul.mubr.f32.vlgmr.msra.gmra.mxu1 %v3296_v45 }
 0x53a   :  { %1441 = vmatpush1.msra.mxu0 %v3160_v51  ;;  %2218 = vmatpush3.msra.mxu1 %v3163_v5 }
 0x53b   :  { %1442 = vmatprep.subr.mxu0 %v3166_v10  ;;  %2219 = vmatprep.subr.mxu1 %v3544_v38 }
 0x53c   :  { %1443 = vmatpush1.msra.mxu0 %v3170_v14  ;;  %2220 = vmatpush3.msra.mxu1 %v3306_v46 }
 0x53d   :  { %1444 = vmatprep.subr.mxu0 %v3174_v36  ;;  %2221 = vmatprep.subr.mxu1 %v3544_v38 }
 0x53e   :  { %1445 = vmatpush1.msra.mxu0 %v3178_v0  ;;  %2222 = vmatpush3.msra.mxu1 %v3312_v47 }
 0x53f   :  { %1446 = vmatprep.subr.mxu0 %v3182_v43  ;;  %2223 = vmatprep.subr.mxu1 %v3544_v38 }
 0x540   :  { %1447 = vmatpush1.msra.mxu0 %v3186_v4  ;;  %2224 = vmatpush3.msra.mxu1 %v3318_v48 }
 0x541   :  { %1448 = vmatprep.subr.mxu0 %v3190_v53  ;;  %2225 = vmatprep.subr.mxu1 %v3544_v38 }
 0x542   :  { %1449 = vmatpush1.msra.mxu0 %v3194_v6  ;;  %2226 = vmatpush3.msra.mxu1 %v3324_v50 }
 0x543   :  { %1450 = vmatprep.subr.mxu0 %v3198_v55  ;;  %2227 = vmatprep.subr.mxu1 %v3544_v38 }
 0x544   :  { %1451 = vmatpush1.msra.mxu0 %v3202_v54  ;;  %2228 = vmatpush3.msra.mxu1 %v3330_v7 }
 0x545   :  { %1452 = vmatprep.subr.mxu0 %v3206_v56  ;;  %2229 = vmatprep.subr.mxu1 %v3544_v38 }
 0x546   :  { %1453 = vmatpush1.msra.mxu0 %v3210_v24  ;;  %2230 = vmatpush3.msra.mxu1 %v3336_v3 }
 0x547   :  { %1454 = vmatprep.subr.mxu0 %v3214_v57  ;;  %2231 = vmatprep.subr.mxu1 %v3544_v38 }
 0x548   :  { %1455 = vmatpush1.msra.mxu0 %v3218_v9  ;;  %2232 = vmatpush3.msra.mxu1 %v3342_v12 }
 0x549   :  { %1456 = vmatprep.subr.mxu0 %v3222_v58  ;;  %2233 = vmatprep.subr.mxu1 %v3544_v38 }
 0x54a   :  { %1457 = vmatpush1.msra.mxu0 %v3226_v26  ;;  %2234 = vmatpush3.msra.mxu1 %v3348_v13 }
 0x54b   :  { %1458 = vmatprep.subr.mxu0 %v3230_v59  ;;  %2235 = vmatprep.subr.mxu1 %v3544_v38 }
 0x54c   :  { %1459 = vmatpush1.msra.mxu0 %v3234_v49  ;;  %2236 = vmatpush3.msra.mxu1 %v3354_v15 }
 0x54d   :  { %1460 = vmatprep.subr.mxu0 %v3238_v60  ;;  %2237 = vmatprep.subr.mxu1 %v3544_v38 }
 0x54e   :  { %1461 = vmatpush1.msra.mxu0 %v3242_v32  ;;  %2238 = vmatpush3.msra.mxu1 %v3360_v19 }
 0x54f   :  { %1462 = vmatprep.subr.mxu0 %v3246_v61  ;;  %2239 = vmatprep.subr.mxu1 %v3544_v38 }
 0x550   :  { %1463 = vmatpush1.msra.mxu0 %v3250_v20  ;;  %2240 = vmatpush3.msra.mxu1 %v3366_v21 }
 0x551   :  { %1464 = vmatprep.subr.mxu0 %v3254_v62  ;;  %2241 = vmatprep.subr.mxu1 %v3544_v38 }
 0x552   :  { %1465 = vmatpush1.msra.mxu0 %v3258_v30  ;;  %2242 = vmatpush3.msra.mxu1 %v3372_v22 }
 0x553   :  { %1466 = vmatprep.subr.mxu0 %v3262_v63  ;;  %2243 = vmatprep.subr.mxu1 %v3544_v38 }
 0x554   :  { %1467 = vmatpush1.msra.mxu0 %v3266_v18  ;;  %2244 = vmatpush3.msra.mxu1 %v3378_v23 }
 0x555   :  { %1468 = vmatprep.subr.mxu0 %v3270_v1  ;;  %2245 = vmatprep.subr.mxu1 %v3544_v38 }
 0x556   :  { %1469 = vmatpush1.msra.mxu0 %v3274_v8  ;;  %2246 = vmatpush3.msra.mxu1 %v3384_v25 }
 0x557   :  { %1470 = vmatprep.subr.mxu0 %v3278_v2  ;;  %2247 = vmatprep.subr.mxu1 %v3544_v38  ;;  %v3580_v2 = vld [vmem:[#allocation39_spill] sm:$0xff] }
 0x558   :  { %1471 = vmatpush1.msra.mxu0 %v3282_v11  ;;  %1504 = vmatprep.mubr.f32.mxu0 %v3544_v38 }
 0x559   :  { %2248 = vmatpush3.msra.mxu1 %v3391_v27  ;;  %2249 = vmatprep.mubr.msk.f32.mxu1 %vm2543_vm1, %v3544_v38 }
 0x55a   :  { %1608 = vmatprep.subr.mxu0 %v3146_v17  ;;  %2252 = vmatprep.subr.mxu1 %v3544_v38 }
 0x5f9   :  { %v1338_v28 = vpop.f32.mrf.mxu0  ;;  %v1409_v16 = vpop.f32.mrf.mxu1 }
 0x5fa   :  { %v1413_v31 = vadd.f32 %v1338_v28, %v3578_v29  ;;  %v1427_v17 = vadd.f32 %v2919_v52, %v1409_v16  ;;  %v3581_v52 = vld [vmem:[#allocation23_spill] sm:$0xff] }
 0x5fb   :  { %v2216_v33 = vpop.f32.mrf.mxu1  ;;  %v1340_v35 = vpop.f32.mrf.mxu0 }
 0x5fc   :  { %v1833_v34 = vmul.f32 -1.442695, %v1413_v31  ;;  %v1414_v39 = vadd.f32 %v1340_v35, %v3579_v37 }
 0x5fe   :  { %2348 = vpow2.f32 %v1833_v34  ;;  %v1834_v40 = vmul.f32 -1.442695, %v1414_v39 }
 0x600   :  { %2350 = vpow2.f32 %v1834_v40 }
 0x60b   :  { %v2349_v41 = vpop.eup %2348 }
 0x60c   :  { %v1418_v42 = vadd.f32 1.0, %v2349_v41 }
 0x60d   :  { %v2351_v44 = vpop.eup %2350 }
 0x60e   :  { %2352 = vrcp.f32 %v1418_v42  ;;  %v1424_v8 = vadd.f32 1.0, %v2351_v44 }
 0x61b   :  { %v2353_v27 = vpop.eup %2352 }
 0x61c   :  { %v1428_v11 = vmul.f32 %v2353_v27, %v1427_v17 }
 0x61e   :  { %v1429_v25 = vadd.f32 %v1428_v11, %v3580_v2  ;;  %v3589_v2 = vld [vmem:[#allocation35_spill] sm:$0xff] }
 0x620   :  { %2354 = vtanh.f32 %v1429_v25 }
 0x621   :  { %2356 = vrcp.f32 %v1424_v8 }
 0x62d   :  { %v2355_v28 = vpop.eup %2354 }
 0x62e   :  { %v1431_v29 = vsub.f32 %v3296_v45, %v2355_v28  ;;  %v2357_v31 = vpop.eup %2356 }
 0x630   :  { %v1432_v33 = vmul.f32 %v2357_v31, %v1431_v29 }
 0x632   :  { %v3403_v34 = vadd.f32 %v2355_v28, %v1432_v33 }
 0x634   :  { %1435 = vst [vmem:[#allocation10 + $0x28] sm:$0xff] %v3403_v34  ;;  %1505 = vmatmul.mubr.f32.vlgmr.msra.gmra.mxu0 %v3403_v34  ;;  %2250 = vmatmul.mubr.f32.vlgmr.msra.gmra.mxu1 %v3403_v34 }
 0x635   :  { %1609 = vmatpush1.msra.mxu0 %v3160_v51  ;;  %2253 = vmatpush3.msra.mxu1 %v3163_v5  ;;  %v3582_v51 = vld [vmem:[#allocation25_spill] sm:$0xff]  ;;  %v3583_v5 = vld [vmem:[#allocation24_spill] sm:$0xff] }
 0x636   :  { %1610 = vmatprep.subr.mxu0 %v3166_v10  ;;  %2254 = vmatprep.subr.mxu1 %v3544_v38  ;;  %v3584_v10 = vld [vmem:[#allocation17_spill] sm:$0xff] }
 0x637   :  { %1611 = vmatpush1.msra.mxu0 %v3170_v14  ;;  %2255 = vmatpush3.msra.mxu1 %v3306_v46  ;;  %v3585_v14 = vld [vmem:[#allocation26_spill] sm:$0xff] }
 0x638   :  { %1612 = vmatprep.subr.mxu0 %v3174_v36  ;;  %2256 = vmatprep.subr.mxu1 %v3544_v38 }
 0x639   :  { %1613 = vmatpush1.msra.mxu0 %v3178_v0  ;;  %2257 = vmatpush3.msra.mxu1 %v3312_v47 }
 0x63a   :  { %1614 = vmatprep.subr.mxu0 %v3182_v43  ;;  %2258 = vmatprep.subr.mxu1 %v3544_v38  ;;  %v3586_v43 = vld [vmem:[#allocation33_spill] sm:$0xff] }
 0x63b   :  { %1615 = vmatpush1.msra.mxu0 %v3186_v4  ;;  %2259 = vmatpush3.msra.mxu1 %v3318_v48  ;;  %v3590_v48 = vld [vmem:[#allocation36_spill] sm:$0xff] }
 0x63c   :  { %1616 = vmatprep.subr.mxu0 %v3190_v53  ;;  %2260 = vmatprep.subr.mxu1 %v3544_v38 }
 0x63d   :  { %1617 = vmatpush1.msra.mxu0 %v3194_v6  ;;  %2261 = vmatpush3.msra.mxu1 %v3324_v50 }
 0x63e   :  { %1618 = vmatprep.subr.mxu0 %v3198_v55  ;;  %2262 = vmatprep.subr.mxu1 %v3544_v38 }
 0x63f   :  { %1619 = vmatpush1.msra.mxu0 %v3202_v54  ;;  %2263 = vmatpush3.msra.mxu1 %v3330_v7  ;;  %v3587_v54 = vld [vmem:[#allocation34_spill] sm:$0xff] }
 0x640   :  { %1620 = vmatprep.subr.mxu0 %v3206_v56  ;;  %2264 = vmatprep.subr.mxu1 %v3544_v38 }
 0x641   :  { %1621 = vmatpush1.msra.mxu0 %v3210_v24  ;;  %2265 = vmatpush3.msra.mxu1 %v3336_v3 }
 0x642   :  { %1622 = vmatprep.subr.mxu0 %v3214_v57  ;;  %2266 = vmatprep.subr.mxu1 %v3544_v38 }
 0x643   :  { %1623 = vmatpush1.msra.mxu0 %v3218_v9  ;;  %2267 = vmatpush3.msra.mxu1 %v3342_v12 }
 0x644   :  { %1624 = vmatprep.subr.mxu0 %v3222_v58  ;;  %2268 = vmatprep.subr.mxu1 %v3544_v38 }
 0x645   :  { %1625 = vmatpush1.msra.mxu0 %v3226_v26  ;;  %2269 = vmatpush3.msra.mxu1 %v3348_v13 }
 0x646   :  { %1626 = vmatprep.subr.mxu0 %v3230_v59  ;;  %2270 = vmatprep.subr.mxu1 %v3544_v38 }
 0x647   :  { %1627 = vmatpush1.msra.mxu0 %v3234_v49  ;;  %2271 = vmatpush3.msra.mxu1 %v3354_v15 }
 0x648   :  { %1628 = vmatprep.subr.mxu0 %v3238_v60  ;;  %2272 = vmatprep.subr.mxu1 %v3544_v38  ;;  %v3588_v60 = vld [vmem:[#allocation42_spill] sm:$0xff] }
 0x649   :  { %1629 = vmatpush1.msra.mxu0 %v3242_v32  ;;  %2273 = vmatpush3.msra.mxu1 %v3360_v19 }
 0x64a   :  { %1630 = vmatprep.subr.mxu0 %v3246_v61  ;;  %2274 = vmatprep.subr.mxu1 %v3544_v38 }
 0x64b   :  { %1631 = vmatpush1.msra.mxu0 %v3250_v20  ;;  %2275 = vmatpush3.msra.mxu1 %v3366_v21 }
 0x64c   :  { %1632 = vmatprep.subr.mxu0 %v3254_v62  ;;  %2276 = vmatprep.subr.mxu1 %v3544_v38 }
 0x64d   :  { %1633 = vmatpush1.msra.mxu0 %v3258_v30  ;;  %2277 = vmatpush3.msra.mxu1 %v3372_v22  ;;  %v3591_v22 = vld [vmem:[#allocation41_spill] sm:$0xff] }
 0x64e   :  { %1634 = vmatprep.subr.mxu0 %v3262_v63  ;;  %2278 = vmatprep.subr.mxu1 %v3544_v38 }
 0x64f   :  { %1635 = vmatpush1.msra.mxu0 %v3266_v18  ;;  %2279 = vmatpush3.msra.mxu1 %v3378_v23 }
 0x650   :  { %1636 = vmatprep.subr.mxu0 %v3270_v1  ;;  %2280 = vmatprep.subr.mxu1 %v3544_v38 }
 0x651   :  { %1637 = vmatpush1.msra.mxu0 %v3581_v52  ;;  %2281 = vmatpush3.msra.mxu1 %v3582_v51 }
 0x652   :  { %1638 = vmatprep.subr.mxu0 %v3583_v5  ;;  %2282 = vmatprep.subr.mxu1 %v3544_v38 }
 0x653   :  { %1639 = vmatpush1.msra.mxu0 %v3584_v10  ;;  %1672 = vmatprep.mubr.f32.mxu0 %v3544_v38 }
 0x654   :  { %2283 = vmatpush3.msra.mxu1 %v3585_v14  ;;  %2284 = vmatprep.mubr.msk.f32.mxu1 %vm2543_vm1, %v3544_v38  ;;  %v2426_v38 = vld [vmem:[%s3496_s4] ss:$0 sm:$0xff]  ;;  %s2544_s4 = smov [#allocation10]  }
 0x655   :  { %s1779_s18 = sshll.u32 %s2544_s4, 4  ;;  %s1780_s18 = int_to_ptr.vmem [resolvable:$true] %s1779_s18 }
 0x656   :  { %s2487_s21 = scalar_lea.vmem %s1780_s18, 1024  ;;  %p2492_p2 = scmp.lt.s32.totalorder %s1780_s18, %s1780_s18 }
 0x657   :  { %p2488_p1 = scmp.ne.s32.totalorder %s1780_s18, %s2487_s21  ;;  %p2493_p3 = scmp.lt.s32.totalorder %s2487_s21, %s2487_s21 }
 0x659   :  { %p2494_p4 = por %p2493_p3, %p2492_p2 }
 0x65b   :  { %p2495_p5 = pnand %p2494_p4, %p2488_p1 }
 0x6f4   :  { %v1506_v36 = vpop.f32.mrf.mxu0  ;;  %v1577_v0 = vpop.f32.mrf.mxu1 }
 0x6f5   :  { %v1581_v4 = vadd.f32 %v1506_v36, %v3586_v43  ;;  %v1595_v26 = vadd.f32 %v2426_v38, %v1577_v0 }
 0x6f6   :  { %v2251_v53 = vpop.f32.mrf.mxu1  ;;  %v1508_v55 = vpop.f32.mrf.mxu0 }
 0x6f7   :  { %v1835_v6 = vmul.f32 -1.442695, %v1581_v4  ;;  %v1582_v56 = vadd.f32 %v1508_v55, %v3587_v54 }
 0x6f9   :  { %2358 = vpow2.f32 %v1835_v6  ;;  %v1836_v24 = vmul.f32 -1.442695, %v1582_v56 }
 0x6fb   :  { %2360 = vpow2.f32 %v1836_v24 }
 0x706   :  { %v2359_v57 = vpop.eup %2358 }
 0x707   :  { %v1586_v9 = vadd.f32 1.0, %v2359_v57 }
 0x708   :  { %v2361_v58 = vpop.eup %2360 }
 0x709   :  { %2362 = vrcp.f32 %v1586_v9  ;;  %v1592_v61 = vadd.f32 1.0, %v2361_v58 }
 0x716   :  { %v2363_v59 = vpop.eup %2362 }
 0x717   :  { %v1596_v49 = vmul.f32 %v2363_v59, %v1595_v26 }
 0x719   :  { %v1597_v32 = vadd.f32 %v1596_v49, %v3588_v60 }
 0x71b   :  { %2364 = vtanh.f32 %v1597_v32 }
 0x71c   :  { %2366 = vrcp.f32 %v1592_v61 }
 0x728   :  { %v2365_v20 = vpop.eup %2364 }
 0x729   :  { %v1599_v62 = vsub.f32 %v3403_v34, %v2365_v20  ;;  %v2367_v30 = vpop.eup %2366 }
 0x72b   :  { %v1600_v63 = vmul.f32 %v2367_v30, %v1599_v62 }
 0x72d   :  { %v1601_v18 = vadd.f32 %v2365_v20, %v1600_v63 }
 0x72f   :  { %1603 = vst [vmem:[#allocation10 + $0x30] sm:$0xff] %v1601_v18  ;;  %1673 = vmatmul.mubr.f32.vlgmr.msra.gmra.mxu0 %v1601_v18  ;;  %2285 = vmatmul.mubr.f32.vlgmr.msra.gmra.mxu1 %v1601_v18 }
 0x7ef   :  { %v1674_v1 = vpop.f32.mrf.mxu0  ;;  %v1745_v8 = vpop.f32.mrf.mxu1 }
 0x7f0   :  { %v1749_v11 = vadd.f32 %v1674_v1, %v3589_v2  ;;  %v1763_v15 = vadd.f32 %v2426_v38, %v1745_v8 }
 0x7f1   :  { %v2286_v45 = vpop.f32.mrf.mxu1  ;;  %v1676_v47 = vpop.f32.mrf.mxu0 }
 0x7f2   :  { %v1837_v46 = vmul.f32 -1.442695, %v1749_v11  ;;  %v1750_v50 = vadd.f32 %v1676_v47, %v3590_v48 }
 0x7f4   :  { %2368 = vpow2.f32 %v1837_v46  ;;  %v1838_v7 = vmul.f32 -1.442695, %v1750_v50 }
 0x7f6   :  { %2370 = vpow2.f32 %v1838_v7 }
 0x801   :  { %v2369_v3 = vpop.eup %2368 }
 0x802   :  { %v1754_v12 = vadd.f32 1.0, %v2369_v3 }
 0x803   :  { %v2371_v13 = vpop.eup %2370 }
 0x804   :  { %2372 = vrcp.f32 %v1754_v12  ;;  %v1760_v25 = vadd.f32 1.0, %v2371_v13 }
 0x811   :  { %v2373_v19 = vpop.eup %2372 }
 0x812   :  { %v1764_v21 = vmul.f32 %v2373_v19, %v1763_v15 }
 0x814   :  { %v1765_v23 = vadd.f32 %v1764_v21, %v3591_v22 }
 0x816   :  { %2374 = vtanh.f32 %v1765_v23 }
 0x817   :  { %2376 = vrcp.f32 %v1760_v25 }
 0x823   :  { %v2375_v27 = vpop.eup %2374 }
 0x824   :  { %v1767_v16 = vsub.f32 %v1601_v18, %v2375_v27  ;;  %v2377_v35 = vpop.eup %2376 }
 0x826   :  { %v1768_v37 = vmul.f32 %v2377_v35, %v1767_v16 }
 0x828   :  { %v1769_v39 = vadd.f32 %v2375_v27, %v1768_v37 }
 0x82a   :  { %1771 = vst [vmem:[#allocation10 + $0x38] sm:$0xff] %v1769_v39  ;;  %1773 = vst [vmem:[#allocation11] sm:$0xff] %v1769_v39 }
 0x82b   :  { %2498 = shalt.err (!%p2495_p5)
}
 0x82c   :  { %1785 = dma.vmem_to_hbm [thread:$0]  %s1780_s18, 1024, %s3497_s5, [#allocation6], %s2539_s7, %s2539_s7, %s2540_s8  }
 0x82d   :  { %s2507_s24 = scalar_lea.vmem %s1793_s20, 128  ;;  %p2512_p7 = scmp.lt.s32.totalorder %s1793_s20, %s1793_s20 }
 0x82e   :  { %p2508_p6 = scmp.ne.s32.totalorder %s1793_s20, %s2507_s24  ;;  %p2513_p8 = scmp.lt.s32.totalorder %s2507_s24, %s2507_s24 }
 0x830   :  { %p2514_p9 = por %p2513_p8, %p2512_p7 }
 0x832   :  { %p2515_p10 = pnand %p2514_p9, %p2508_p6 }
 0x834   :  { %2518 = shalt.err (!%p2515_p10)
}
 0x835   :  { %1795 = dma.vmem_to_hbm [thread:$0]  %s1793_s20, 128, %s3498_s6, [#allocation12]  }
 0x836   :  { %2531 = dma.done.wait [#allocation6], 1024  }
 0x837   :  { %2532 = vsyncadd [#allocation6], 4294966272 }
 0x838   :  { %2533 = dma.done.wait [#allocation12], 128  }
 0x839   :  { %2534 = vsyncadd [#allocation12], 4294967168 }
 0x83a   :  { %1802 = vsyncpa [#allocation5], 1 }
 0x83b   :  { %1803 = vsyncpa [#allocation8], 1 }
 0x83c   :  { %1804 = vsyncpa [#allocation6], 1 }
 0x83d   :  { %1805 = vsyncpa [#allocation12], 1 }

</bundles_post_ra>
